<compile_context>
chip_gen: v7x
topology: tpu7x:2x2x1
jax: 0.10.0
libtpu: 0.0.40
codegen_flags: <defaults>
</compile_context>

<pallas_src>
import functools

import jax
import jax.numpy as jnp
import numpy as np
from jax import lax
from jax.experimental import pallas as pl
from jax.experimental.pallas import tpu as pltpu

BN_EPS = 1e-5
K1_MAX_TILE_ROWS = 1024   # stats kernel, rows of (B*N*K, C) per grid step
K2_MAX_TILE_ROWS = 1024   # attention kernel, rows of (B*N, K*C) per grid step
                          # (safe on v7x's 64 MiB VMEM; could be 2048 on v5e/v6e)


def _round_up(x, m):
    return (x + m - 1) // m * m


def _cdiv(a, b):
    return -(-a // b)


# ----------------------------------------------------------------------------
# Kernel 1: Gram-matrix batch statistics for z = x @ W (q and k fused, pure
# MXU work).  Outputs per-core partial accumulators:
#   gram: (2, 2C, C)   rows [0:C]  = sum_r qx_r qx_r^T,  rows [C:2C] = same for k
#   sums: (2, 16, C)   rows [0:8]  = column sums of qx (8 identical rows),
#                      rows [8:16] = column sums of kx
# ----------------------------------------------------------------------------
def _stats_kernel(qx_ref, kx_ref, gram_ref, sum_ref):
    @pl.when(pl.program_id(1) == 0)
    def _():
        gram_ref[...] = jnp.zeros_like(gram_ref)
        sum_ref[...] = jnp.zeros_like(sum_ref)

    qx = qx_ref[...].astype(jnp.bfloat16)            # (tr, C)
    kx = kx_ref[...].astype(jnp.bfloat16)
    tr, C = qx.shape
    ones8 = jnp.ones((8, tr), jnp.bfloat16)          # ones-row matmul -> MXU
    dn = (((0,), (0,)), ((), ()))                    # contract rows: x^T x

    gram_ref[0, :C, :] += lax.dot_general(qx, qx, dn,
                                          preferred_element_type=jnp.float32)
    gram_ref[0, C:, :] += lax.dot_general(kx, kx, dn,
                                          preferred_element_type=jnp.float32)
    sum_ref[0, :8, :] += jnp.dot(ones8, qx, preferred_element_type=jnp.float32)
    sum_ref[0, 8:, :] += jnp.dot(ones8, kx, preferred_element_type=jnp.float32)


def _qk_batch_stats(q2d, k2d, w):
    """q2d/k2d: (R, C) raw inputs (caller dtype).  Returns mean/var of x@W."""
    R, C = q2d.shape
    tr = min(K1_MAX_TILE_ROWS, max(8, _round_up(R, 16) // 2))
    n_steps = _cdiv(R, 2 * tr)
    r_pad = 2 * tr * n_steps
    if r_pad != R:   # zero rows contribute nothing to Gram / column sums
        q2d = jnp.pad(q2d, ((0, r_pad - R), (0, 0)))
        k2d = jnp.pad(k2d, ((0, r_pad - R), (0, 0)))

    gram, sums = pl.pallas_call(
        _stats_kernel,
        out_shape=(jax.ShapeDtypeStruct((2, 2 * C, C), jnp.float32),
                   jax.ShapeDtypeStruct((2, 16, C), jnp.float32)),
        grid_spec=pltpu.PrefetchScalarGridSpec(
            num_scalar_prefetch=0,
            grid=(2, n_steps),                       # (core-split, reduction)
            in_specs=[
                pl.BlockSpec((tr, C), lambda p, i, ns=n_steps: (p * ns + i, 0)),
                pl.BlockSpec((tr, C), lambda p, i, ns=n_steps: (p * ns + i, 0)),
            ],
            out_specs=[
                pl.BlockSpec((1, 2 * C, C), lambda p, i: (p, 0, 0)),
                pl.BlockSpec((1, 16, C), lambda p, i: (p, 0, 0)),
            ]),
        compiler_params=pltpu.CompilerParams(
            dimension_semantics=("parallel", "arbitrary")),
    )(q2d, k2d)

    # Recover the tiny per-channel stats of z = x @ W from the Gram.
    Gq = gram[:, :C, :].sum(axis=0)                  # (C, C)
    Gk = gram[:, C:, :].sum(axis=0)
    sq = sums[:, 0, :].sum(axis=0)                   # (C,)
    sk = sums[:, 8, :].sum(axis=0)

    q_mean = (sq @ w) / R
    k_mean = (sk @ w) / R
    q_ex2 = jnp.sum(w * (Gq @ w), axis=0) / R        # diag(W^T Gq W) / R
    k_ex2 = jnp.sum(w * (Gk @ w), axis=0) / R
    # NOTE: one-pass E[z^2] - mean^2 can cancel for |mean| >> std; clamp at 0.
    q_var = jnp.maximum(q_ex2 - q_mean * q_mean, 0.0)
    k_var = jnp.maximum(k_ex2 - k_mean * k_mean, 0.0)
    return q_mean, q_var, k_mean, k_var


# ----------------------------------------------------------------------------
# Kernel 2: projection + BN affine + per-head dot(q, k[K=0]) + sigmoid.
# bf16 MXU operands, f32 accumulation/epilogue, lane-dense padded output.
# ----------------------------------------------------------------------------
def _attn_kernel(q_ref, k_ref, wq_ref, wk_ref, red_ref,
                 qsc_ref, qsh_ref, ksc_ref, ksh_ref, o_ref):
    q = q_ref[...].astype(jnp.bfloat16)              # (T, K*C)
    k = k_ref[...].astype(jnp.bfloat16)              # (T, C)
    qn = jnp.dot(q, wq_ref[...], preferred_element_type=jnp.float32)
    qn = qn * qsc_ref[...] + qsh_ref[...]            # (T, K*Cout), f32 epilogue
    kn = jnp.dot(k, wk_ref[...], preferred_element_type=jnp.float32)
    kn = kn * ksc_ref[...] + ksh_ref[...]            # (T, K*Cout)
    p = (qn * kn).astype(jnp.bfloat16)
    s = jnp.dot(p, red_ref[...],
                preferred_element_type=jnp.float32)  # (T, out_w) lane-dense
    o_ref[...] = jax.nn.sigmoid(s)


# ----------------------------------------------------------------------------
# Wrapper replicating MultiHeadGuidanceQK.forward (training-mode BatchNorm).
# ----------------------------------------------------------------------------
@functools.partial(jax.jit, static_argnames=("num_heads", "key_dim"))
def multi_head_guidance_qk(q, k, params, *, num_heads, key_dim):
    B, N, K, C = q.shape
    H, D = num_heads, key_dim
    Cout = H * D
    scale = float(key_dim) ** (-0.5)
    root_scale = scale ** 0.5

    w = params["w"].astype(jnp.float32)              # (C, Cout)
    gamma = params["gamma"].astype(jnp.float32)      # (Cout,)
    beta = params["beta"].astype(jnp.float32)        # (Cout,)
    # params["b"] (Linear bias) intentionally unused: training-mode BN cancels
    # any per-channel constant shift.

    R = B * N * K
    q2d = q.reshape(R, C)                            # reshape-only view
    k2d = k.reshape(R, C)

    # ---- pass 1: batch statistics of x@W for q and k (Gram formulation) ----
    q_mean, q_var, k_mean, k_var = _qk_batch_stats(q2d, k2d, w)

    # Fold BN (batch stats) + 1/sqrt(key_dim) into per-channel scale / shift.
    q_g = gamma * lax.rsqrt(q_var + BN_EPS)
    k_g = gamma * lax.rsqrt(k_var + BN_EPS)
    q_sc = q_g * root_scale
    q_sh = (beta - q_mean * q_g) * root_scale
    k_sc = k_g * root_scale
    k_sh = (beta - k_mean * k_g) * root_scale

    # ---- constants for the fused attention kernel (bf16 MXU operands) ----
    # TODO(synk): kron(I_K, w) / red grow quadratically in K; for large K
    # switch the q projection to a (T*K, C)@(C, Cout) layout and reduce per
    # head on a (T*K, Cout) slab instead.
    w_bf = params["w"].astype(jnp.bfloat16)
    eye_k = jnp.eye(K, dtype=jnp.bfloat16)
    wq_big = jnp.kron(eye_k, w_bf)                   # (K*C, K*Cout)
    wk_big = jnp.tile(w_bf, (1, K))                  # (C,   K*Cout)
    out_w = _round_up(K * H, 128)                    # lane-dense output width
    red = jnp.kron(jnp.eye(K * H, dtype=jnp.bfloat16),
                   jnp.ones((D, 1), jnp.bfloat16))   # (K*Cout, K*H)
    red = jnp.pad(red, ((0, 0), (0, out_w - K * H))) # zero-padded columns
    qsc_big = jnp.tile(q_sc, K)[None, :]
    qsh_big = jnp.tile(q_sh, K)[None, :]
    ksc_big = jnp.tile(k_sc, K)[None, :]
    ksh_big = jnp.tile(k_sh, K)[None, :]

    # ---- pass 2: project + normalize + per-head dot + sigmoid ----
    rows = B * N
    q2 = q.reshape(rows, K * C)                      # contiguous view
    k0 = k[:, :, 0, :].reshape(rows, C)              # only K=0 neighbour used

    t2 = min(K2_MAX_TILE_ROWS, max(8, _round_up(rows, 16) // 2))
    rows_pad = _round_up(rows, t2)
    if rows_pad != rows:
        q2 = jnp.pad(q2, ((0, rows_pad - rows), (0, 0)))
        k0 = jnp.pad(k0, ((0, rows_pad - rows), (0, 0)))

    out = pl.pallas_call(
        _attn_kernel,
        out_shape=jax.ShapeDtypeStruct((rows_pad, out_w), jnp.float32),
        grid_spec=pltpu.PrefetchScalarGridSpec(
            num_scalar_prefetch=0,
            grid=(rows_pad // t2,),
            in_specs=[
                pl.BlockSpec((t2, K * C), lambda i: (i, 0)),
                pl.BlockSpec((t2, C), lambda i: (i, 0)),
                pl.BlockSpec((K * C, K * Cout), lambda i: (0, 0)),
                pl.BlockSpec((C, K * Cout), lambda i: (0, 0)),
                pl.BlockSpec((K * Cout, out_w), lambda i: (0, 0)),
                pl.BlockSpec((1, K * Cout), lambda i: (0, 0)),
                pl.BlockSpec((1, K * Cout), lambda i: (0, 0)),
                pl.BlockSpec((1, K * Cout), lambda i: (0, 0)),
                pl.BlockSpec((1, K * Cout), lambda i: (0, 0)),
            ],
            out_specs=pl.BlockSpec((t2, out_w), lambda i: (i, 0)),
        ),
        compiler_params=pltpu.CompilerParams(
            dimension_semantics=("parallel",),
            vmem_limit_bytes=32 * 1024 * 1024,
        ),
    )(q2, k0, wq_big, wk_big, red, qsc_big, qsh_big, ksc_big, ksh_big)

    return out[:rows, :K * H].reshape(B, N, K, H)


# ----------------------------------------------------------------------------
# Pure-JAX reference (mirrors the PyTorch forward with training-mode BN)
# ----------------------------------------------------------------------------
def reference(q, k, params, *, num_heads, key_dim):
    w, b = params["w"], params["b"]
    gamma, beta = params["gamma"], params["beta"]

    def bn_linear(x):
        y = x @ w + b                                # (B, N, K, Cout)
        mean = jnp.mean(y, axis=(0, 1, 2))
        var = jnp.var(y, axis=(0, 1, 2))             # biased
        return (y - mean) / jnp.sqrt(var + BN_EPS) * gamma + beta

    B, N, K, _ = q.shape
    qn = bn_linear(q).reshape(B, N, K, num_heads, key_dim)
    kn = bn_linear(k).reshape(B, N, K, num_heads, key_dim)[:, :, 0]  # (B,N,H,D)
    s = jnp.einsum("bnkhd,bnhd->bnkh", qn, kn) * key_dim ** (-0.5)
    return jax.nn.sigmoid(s)


if __name__ == "__main__":
    key = jax.random.PRNGKey(0)
    B, N, K = 2, 16, 8
    num_heads, num_hiddens, key_dim = 4, 32, 8
    Cout = num_heads * key_dim

    k1, k2, k3, k4, k5, k6 = jax.random.split(key, 6)
    q = jax.random.normal(k1, (B, N, K, num_hiddens), jnp.float32)
    kx = jax.random.normal(k2, (B, N, K, num_hiddens), jnp.float32)

    # Deterministic synthetic parameters (nn.Linear weight/bias, BN gamma/beta).
    params = dict(
        w=0.1 * jax.random.normal(k3, (num_hiddens, Cout), jnp.float32),
        b=0.05 * jax.random.normal(k4, (1, Cout), jnp.float32),
        gamma=1.0 + 0.1 * jax.random.normal(k5, (Cout,), jnp.float32),
        beta=0.1 * jax.random.normal(k6, (Cout,), jnp.float32),
    )

    out = multi_head_guidance_qk(q, kx, params,
                                 num_heads=num_heads, key_dim=key_dim)
    out = jax.block_until_ready(out)

    ref = reference(q, kx, params, num_heads=num_heads, key_dim=key_dim)
    assert out.shape == (B, N, K, num_heads)
    assert np.all(np.isfinite(np.asarray(out)))
    assert np.allclose(np.asarray(out), np.asarray(ref), atol=5e-2), (
        float(np.max(np.abs(np.asarray(out) - np.asarray(ref)))))
    print("KERNEL_OK")
</pallas_src>

<mosaic_0001>
module attributes {stable_mosaic.version = 11 : i64} {
  func.func @_stats_kernel(%arg0: i32, %arg1: i32, %arg2: memref<128x32xf32, #tpu.memory_space<vmem>>, %arg3: memref<128x32xf32, #tpu.memory_space<vmem>>, %arg4: memref<1x64x32xf32, #tpu.memory_space<vmem>>, %arg5: memref<1x16x32xf32, #tpu.memory_space<vmem>>) attributes {dimension_semantics = [#tpu.dimension_semantics<parallel>, #tpu.dimension_semantics<arbitrary>], iteration_bounds = array<i64: 2, 1>, scalar_prefetch = 0 : i64, scratch_operands = 0 : i64, tpu.core_type = #tpu.core_type<tc>, window_params = [{transform_indices = @transform_0, window_bounds = array<i64: 128, 32>}, {transform_indices = @transform_1, window_bounds = array<i64: 128, 32>}, {transform_indices = @transform_2, window_bounds = array<i64: 1, 64, 32>}, {transform_indices = @transform_3, window_bounds = array<i64: 1, 16, 32>}]} {
    %c0_i32 = arith.constant 0 : i32
    %0 = arith.cmpi eq, %arg1, %c0_i32 : i32
    %1 = arith.extui %0 : i1 to i32
    %c0_i32_0 = arith.constant 0 : i32
    %2 = arith.cmpi ne, %1, %c0_i32_0 : i32
    scf.if %2 {
      %cst_30 = arith.constant 0.000000e+00 : f32
      %36 = vector.broadcast %cst_30 : f32 to vector<1x64x32xf32>
      %c0_31 = arith.constant 0 : index
      %c0_32 = arith.constant 0 : index
      %c0_33 = arith.constant 0 : index
      %37 = vector.load %arg4[%c0_31, %c0_32, %c0_33] : memref<1x64x32xf32, #tpu.memory_space<vmem>>, vector<1x64x32xf32>
      tpu.vector_store %arg4[%c0_31, %c0_32, %c0_33], %36 {strides = array<i32>} : memref<1x64x32xf32, #tpu.memory_space<vmem>>, vector<1x64x32xf32>,
      %cst_34 = arith.constant 0.000000e+00 : f32
      %38 = vector.broadcast %cst_34 : f32 to vector<1x16x32xf32>
      %c0_35 = arith.constant 0 : index
      %c0_36 = arith.constant 0 : index
      %c0_37 = arith.constant 0 : index
      %39 = vector.load %arg5[%c0_35, %c0_36, %c0_37] : memref<1x16x32xf32, #tpu.memory_space<vmem>>, vector<1x16x32xf32>
      tpu.vector_store %arg5[%c0_35, %c0_36, %c0_37], %38 {strides = array<i32>} : memref<1x16x32xf32, #tpu.memory_space<vmem>>, vector<1x16x32xf32>,
    } else {
    }
    %c0 = arith.constant 0 : index
    %c0_1 = arith.constant 0 : index
    %3 = vector.load %arg2[%c0, %c0_1] : memref<128x32xf32, #tpu.memory_space<vmem>>, vector<128x32xf32>
    %4 = arith.truncf %3 : vector<128x32xf32> to vector<128x32xbf16>
    %c0_2 = arith.constant 0 : index
    %c0_3 = arith.constant 0 : index
    %5 = vector.load %arg3[%c0_2, %c0_3] : memref<128x32xf32, #tpu.memory_space<vmem>>, vector<128x32xf32>
    %6 = arith.truncf %5 : vector<128x32xf32> to vector<128x32xbf16>
    %cst = arith.constant 1.000000e+00 : bf16
    %7 = vector.broadcast %cst : bf16 to vector<8x128xbf16>
    %c0_4 = arith.constant 0 : index
    %c0_5 = arith.constant 0 : index
    %c0_6 = arith.constant 0 : index
    %8 = vector.load %arg4[%c0_4, %c0_5, %c0_6] : memref<1x64x32xf32, #tpu.memory_space<vmem>>, vector<1x32x32xf32>
    %9 = vector.shape_cast %8 : vector<1x32x32xf32> to vector<32x32xf32>
    %cst_7 = arith.constant dense<0.000000e+00> : vector<32x32xf32>
    %10 = tpu.matmul %4, %4, %cst_7 {dimension_numbers = #tpu.dot_dimension_numbers<[0], [0], [1], [1], [0, 1, 1, 1], [], []>} : vector<128x32xbf16>, vector<128x32xbf16>, vector<32x32xf32> -> vector<32x32xf32>
    %11 = arith.addf %9, %10 : vector<32x32xf32>
    %c0_8 = arith.constant 0 : index
    %c0_9 = arith.constant 0 : index
    %c0_10 = arith.constant 0 : index
    %12 = vector.load %arg4[%c0_8, %c0_9, %c0_10] : memref<1x64x32xf32, #tpu.memory_space<vmem>>, vector<1x32x32xf32>
    %13 = vector.shape_cast %12 : vector<1x32x32xf32> to vector<32x32xf32>
    %14 = vector.shape_cast %11 : vector<32x32xf32> to vector<1x32x32xf32>
    tpu.vector_store %arg4[%c0_8, %c0_9, %c0_10], %14 {strides = array<i32>} : memref<1x64x32xf32, #tpu.memory_space<vmem>>, vector<1x32x32xf32>,
    %c0_11 = arith.constant 0 : index
    %c32 = arith.constant 32 : index
    %c0_12 = arith.constant 0 : index
    %15 = vector.load %arg4[%c0_11, %c32, %c0_12] : memref<1x64x32xf32, #tpu.memory_space<vmem>>, vector<1x32x32xf32>
    %16 = vector.shape_cast %15 : vector<1x32x32xf32> to vector<32x32xf32>
    %cst_13 = arith.constant dense<0.000000e+00> : vector<32x32xf32>
    %17 = tpu.matmul %6, %6, %cst_13 {dimension_numbers = #tpu.dot_dimension_numbers<[0], [0], [1], [1], [0, 1, 1, 1], [], []>} : vector<128x32xbf16>, vector<128x32xbf16>, vector<32x32xf32> -> vector<32x32xf32>
    %18 = arith.addf %16, %17 : vector<32x32xf32>
    %c0_14 = arith.constant 0 : index
    %c32_15 = arith.constant 32 : index
    %c0_16 = arith.constant 0 : index
    %19 = vector.load %arg4[%c0_14, %c32_15, %c0_16] : memref<1x64x32xf32, #tpu.memory_space<vmem>>, vector<1x32x32xf32>
    %20 = vector.shape_cast %19 : vector<1x32x32xf32> to vector<32x32xf32>
    %21 = vector.shape_cast %18 : vector<32x32xf32> to vector<1x32x32xf32>
    tpu.vector_store %arg4[%c0_14, %c32_15, %c0_16], %21 {strides = array<i32>} : memref<1x64x32xf32, #tpu.memory_space<vmem>>, vector<1x32x32xf32>,
    %c0_17 = arith.constant 0 : index
    %c0_18 = arith.constant 0 : index
    %c0_19 = arith.constant 0 : index
    %22 = vector.load %arg5[%c0_17, %c0_18, %c0_19] : memref<1x16x32xf32, #tpu.memory_space<vmem>>, vector<1x8x32xf32>
    %23 = vector.shape_cast %22 : vector<1x8x32xf32> to vector<8x32xf32>
    %cst_20 = arith.constant dense<0.000000e+00> : vector<8x32xf32>
    %24 = tpu.matmul %7, %4, %cst_20 {dimension_numbers = #tpu.dot_dimension_numbers<[1], [0], [0], [1], [0, 0, 1, 1], [], []>} : vector<8x128xbf16>, vector<128x32xbf16>, vector<8x32xf32> -> vector<8x32xf32>
    %25 = arith.addf %23, %24 : vector<8x32xf32>
    %c0_21 = arith.constant 0 : index
    %c0_22 = arith.constant 0 : index
    %c0_23 = arith.constant 0 : index
    %26 = vector.load %arg5[%c0_21, %c0_22, %c0_23] : memref<1x16x32xf32, #tpu.memory_space<vmem>>, vector<1x8x32xf32>
    %27 = vector.shape_cast %26 : vector<1x8x32xf32> to vector<8x32xf32>
    %28 = vector.shape_cast %25 : vector<8x32xf32> to vector<1x8x32xf32>
    tpu.vector_store %arg5[%c0_21, %c0_22, %c0_23], %28 {strides = array<i32>} : memref<1x16x32xf32, #tpu.memory_space<vmem>>, vector<1x8x32xf32>,
    %c0_24 = arith.constant 0 : index
    %c8 = arith.constant 8 : index
    %c0_25 = arith.constant 0 : index
    %29 = vector.load %arg5[%c0_24, %c8, %c0_25] : memref<1x16x32xf32, #tpu.memory_space<vmem>>, vector<1x8x32xf32>
    %30 = vector.shape_cast %29 : vector<1x8x32xf32> to vector<8x32xf32>
    %cst_26 = arith.constant dense<0.000000e+00> : vector<8x32xf32>
    %31 = tpu.matmul %7, %6, %cst_26 {dimension_numbers = #tpu.dot_dimension_numbers<[1], [0], [0], [1], [0, 0, 1, 1], [], []>} : vector<8x128xbf16>, vector<128x32xbf16>, vector<8x32xf32> -> vector<8x32xf32>
    %32 = arith.addf %30, %31 : vector<8x32xf32>
    %c0_27 = arith.constant 0 : index
    %c8_28 = arith.constant 8 : index
    %c0_29 = arith.constant 0 : index
    %33 = vector.load %arg5[%c0_27, %c8_28, %c0_29] : memref<1x16x32xf32, #tpu.memory_space<vmem>>, vector<1x8x32xf32>
    %34 = vector.shape_cast %33 : vector<1x8x32xf32> to vector<8x32xf32>
    %35 = vector.shape_cast %32 : vector<8x32xf32> to vector<1x8x32xf32>
    tpu.vector_store %arg5[%c0_27, %c8_28, %c0_29], %35 {strides = array<i32>} : memref<1x16x32xf32, #tpu.memory_space<vmem>>, vector<1x8x32xf32>,
    return
  }
  func.func @transform_0(%arg0: i32, %arg1: i32) -> (i32, i32) {
    %c1_i32 = arith.constant 1 : i32
    %0 = arith.muli %arg0, %c1_i32 : i32
    %1 = arith.addi %0, %arg1 : i32
    %c0_i32 = arith.constant 0 : i32
    %c0_i32_0 = arith.constant 0 : i32
    return %1, %c0_i32 : i32, i32
  }
  func.func @transform_1(%arg0: i32, %arg1: i32) -> (i32, i32) {
    %c1_i32 = arith.constant 1 : i32
    %0 = arith.muli %arg0, %c1_i32 : i32
    %1 = arith.addi %0, %arg1 : i32
    %c0_i32 = arith.constant 0 : i32
    %c0_i32_0 = arith.constant 0 : i32
    return %1, %c0_i32 : i32, i32
  }
  func.func @transform_2(%arg0: i32, %arg1: i32) -> (i32, i32, i32) {
    %c0_i32 = arith.constant 0 : i32
    %c0_i32_0 = arith.constant 0 : i32
    %c0_i32_1 = arith.constant 0 : i32
    return %arg0, %c0_i32, %c0_i32_0 : i32, i32, i32
  }
  func.func @transform_3(%arg0: i32, %arg1: i32) -> (i32, i32, i32) {
    %c0_i32 = arith.constant 0 : i32
    %c0_i32_0 = arith.constant 0 : i32
    %c0_i32_1 = arith.constant 0 : i32
    return %arg0, %c0_i32, %c0_i32_0 : i32, i32, i32
  }
}

module attributes {stable_mosaic.version = 11 : i64} {
  func.func @_attn_kernel(%arg0: i32, %arg1: memref<16x256xf32, #tpu.memory_space<vmem>>, %arg2: memref<16x32xf32, #tpu.memory_space<vmem>>, %arg3: memref<256x256xbf16, #tpu.memory_space<vmem>>, %arg4: memref<32x256xbf16, #tpu.memory_space<vmem>>, %arg5: memref<256x128xbf16, #tpu.memory_space<vmem>>, %arg6: memref<1x256xf32, #tpu.memory_space<vmem>>, %arg7: memref<1x256xf32, #tpu.memory_space<vmem>>, %arg8: memref<1x256xf32, #tpu.memory_space<vmem>>, %arg9: memref<1x256xf32, #tpu.memory_space<vmem>>, %arg10: memref<16x128xf32, #tpu.memory_space<vmem>>) attributes {dimension_semantics = [#tpu.dimension_semantics<parallel>], iteration_bounds = array<i64: 2>, scalar_prefetch = 0 : i64, scratch_operands = 0 : i64, tpu.core_type = #tpu.core_type<tc>, window_params = [{transform_indices = @transform_0, window_bounds = array<i64: 16, 256>}, {transform_indices = @transform_1, window_bounds = array<i64: 16, 32>}, {pipeline_mode = #tpu.pipeline_mode<synchronous>, transform_indices = @transform_2, window_bounds = array<i64: 256, 256>}, {pipeline_mode = #tpu.pipeline_mode<synchronous>, transform_indices = @transform_3, window_bounds = array<i64: 32, 256>}, {pipeline_mode = #tpu.pipeline_mode<synchronous>, transform_indices = @transform_4, window_bounds = array<i64: 256, 128>}, {pipeline_mode = #tpu.pipeline_mode<synchronous>, transform_indices = @transform_5, window_bounds = array<i64: 1, 256>}, {pipeline_mode = #tpu.pipeline_mode<synchronous>, transform_indices = @transform_6, window_bounds = array<i64: 1, 256>}, {pipeline_mode = #tpu.pipeline_mode<synchronous>, transform_indices = @transform_7, window_bounds = array<i64: 1, 256>}, {pipeline_mode = #tpu.pipeline_mode<synchronous>, transform_indices = @transform_8, window_bounds = array<i64: 1, 256>}, {transform_indices = @transform_9, window_bounds = array<i64: 16, 128>}]} {
    %c0 = arith.constant 0 : index
    %c0_0 = arith.constant 0 : index
    %0 = vector.load %arg1[%c0, %c0_0] : memref<16x256xf32, #tpu.memory_space<vmem>>, vector<16x256xf32>
    %1 = arith.truncf %0 : vector<16x256xf32> to vector<16x256xbf16>
    %c0_1 = arith.constant 0 : index
    %c0_2 = arith.constant 0 : index
    %2 = vector.load %arg2[%c0_1, %c0_2] : memref<16x32xf32, #tpu.memory_space<vmem>>, vector<16x32xf32>
    %3 = arith.truncf %2 : vector<16x32xf32> to vector<16x32xbf16>
    %c0_3 = arith.constant 0 : index
    %c0_4 = arith.constant 0 : index
    %4 = vector.load %arg3[%c0_3, %c0_4] : memref<256x256xbf16, #tpu.memory_space<vmem>>, vector<256x256xbf16>
    %cst = arith.constant dense<0.000000e+00> : vector<16x256xf32>
    %5 = tpu.matmul %1, %4, %cst {dimension_numbers = #tpu.dot_dimension_numbers<[1], [0], [0], [1], [0, 0, 1, 1], [], []>} : vector<16x256xbf16>, vector<256x256xbf16>, vector<16x256xf32> -> vector<16x256xf32>
    %c0_5 = arith.constant 0 : index
    %c0_6 = arith.constant 0 : index
    %6 = vector.load %arg6[%c0_5, %c0_6] : memref<1x256xf32, #tpu.memory_space<vmem>>, vector<1x256xf32>
    %7 = vector.broadcast %6 : vector<1x256xf32> to vector<16x256xf32>
    %8 = arith.mulf %5, %7 : vector<16x256xf32>
    %c0_7 = arith.constant 0 : index
    %c0_8 = arith.constant 0 : index
    %9 = vector.load %arg7[%c0_7, %c0_8] : memref<1x256xf32, #tpu.memory_space<vmem>>, vector<1x256xf32>
    %10 = vector.broadcast %9 : vector<1x256xf32> to vector<16x256xf32>
    %11 = arith.addf %8, %10 : vector<16x256xf32>
    %c0_9 = arith.constant 0 : index
    %c0_10 = arith.constant 0 : index
    %12 = vector.load %arg4[%c0_9, %c0_10] : memref<32x256xbf16, #tpu.memory_space<vmem>>, vector<32x256xbf16>
    %cst_11 = arith.constant dense<0.000000e+00> : vector<16x256xf32>
    %13 = tpu.matmul %3, %12, %cst_11 {dimension_numbers = #tpu.dot_dimension_numbers<[1], [0], [0], [1], [0, 0, 1, 1], [], []>} : vector<16x32xbf16>, vector<32x256xbf16>, vector<16x256xf32> -> vector<16x256xf32>
    %c0_12 = arith.constant 0 : index
    %c0_13 = arith.constant 0 : index
    %14 = vector.load %arg8[%c0_12, %c0_13] : memref<1x256xf32, #tpu.memory_space<vmem>>, vector<1x256xf32>
    %15 = vector.broadcast %14 : vector<1x256xf32> to vector<16x256xf32>
    %16 = arith.mulf %13, %15 : vector<16x256xf32>
    %c0_14 = arith.constant 0 : index
    %c0_15 = arith.constant 0 : index
    %17 = vector.load %arg9[%c0_14, %c0_15] : memref<1x256xf32, #tpu.memory_space<vmem>>, vector<1x256xf32>
    %18 = vector.broadcast %17 : vector<1x256xf32> to vector<16x256xf32>
    %19 = arith.addf %16, %18 : vector<16x256xf32>
    %20 = arith.mulf %11, %19 : vector<16x256xf32>
    %21 = arith.truncf %20 : vector<16x256xf32> to vector<16x256xbf16>
    %c0_16 = arith.constant 0 : index
    %c0_17 = arith.constant 0 : index
    %22 = vector.load %arg5[%c0_16, %c0_17] : memref<256x128xbf16, #tpu.memory_space<vmem>>, vector<256x128xbf16>
    %cst_18 = arith.constant dense<0.000000e+00> : vector<16x128xf32>
    %23 = tpu.matmul %21, %22, %cst_18 {dimension_numbers = #tpu.dot_dimension_numbers<[1], [0], [0], [1], [0, 0, 1, 1], [], []>} : vector<16x256xbf16>, vector<256x128xbf16>, vector<16x128xf32> -> vector<16x128xf32>
    %24 = arith.negf %23 : vector<16x128xf32>
    %25 = math.exp %24 : vector<16x128xf32>
    %cst_19 = arith.constant 1.000000e+00 : f32
    %26 = vector.broadcast %cst_19 : f32 to vector<16x128xf32>
    %27 = arith.addf %26, %25 : vector<16x128xf32>
    %28 = arith.divf %26, %27 : vector<16x128xf32>
    %c0_20 = arith.constant 0 : index
    %c0_21 = arith.constant 0 : index
    %29 = vector.load %arg10[%c0_20, %c0_21] : memref<16x128xf32, #tpu.memory_space<vmem>>, vector<16x128xf32>
    tpu.vector_store %arg10[%c0_20, %c0_21], %28 {strides = array<i32>} : memref<16x128xf32, #tpu.memory_space<vmem>>, vector<16x128xf32>,
    return
  }
  func.func @transform_0(%arg0: i32) -> (i32, i32) {
    %c0_i32 = arith.constant 0 : i32
    %c0_i32_0 = arith.constant 0 : i32
    return %arg0, %c0_i32 : i32, i32
  }
  func.func @transform_1(%arg0: i32) -> (i32, i32) {
    %c0_i32 = arith.constant 0 : i32
    %c0_i32_0 = arith.constant 0 : i32
    return %arg0, %c0_i32 : i32, i32
  }
  func.func @transform_2(%arg0: i32) -> (i32, i32) {
    %c0_i32 = arith.constant 0 : i32
    %c0_i32_0 = arith.constant 0 : i32
    %c0_i32_1 = arith.constant 0 : i32
    return %c0_i32, %c0_i32_0 : i32, i32
  }
  func.func @transform_3(%arg0: i32) -> (i32, i32) {
    %c0_i32 = arith.constant 0 : i32
    %c0_i32_0 = arith.constant 0 : i32
    %c0_i32_1 = arith.constant 0 : i32
    return %c0_i32, %c0_i32_0 : i32, i32
  }
  func.func @transform_4(%arg0: i32) -> (i32, i32) {
    %c0_i32 = arith.constant 0 : i32
    %c0_i32_0 = arith.constant 0 : i32
    %c0_i32_1 = arith.constant 0 : i32
    return %c0_i32, %c0_i32_0 : i32, i32
  }
  func.func @transform_5(%arg0: i32) -> (i32, i32) {
    %c0_i32 = arith.constant 0 : i32
    %c0_i32_0 = arith.constant 0 : i32
    %c0_i32_1 = arith.constant 0 : i32
    return %c0_i32, %c0_i32_0 : i32, i32
  }
  func.func @transform_6(%arg0: i32) -> (i32, i32) {
    %c0_i32 = arith.constant 0 : i32
    %c0_i32_0 = arith.constant 0 : i32
    %c0_i32_1 = arith.constant 0 : i32
    return %c0_i32, %c0_i32_0 : i32, i32
  }
  func.func @transform_7(%arg0: i32) -> (i32, i32) {
    %c0_i32 = arith.constant 0 : i32
    %c0_i32_0 = arith.constant 0 : i32
    %c0_i32_1 = arith.constant 0 : i32
    return %c0_i32, %c0_i32_0 : i32, i32
  }
  func.func @transform_8(%arg0: i32) -> (i32, i32) {
    %c0_i32 = arith.constant 0 : i32
    %c0_i32_0 = arith.constant 0 : i32
    %c0_i32_1 = arith.constant 0 : i32
    return %c0_i32, %c0_i32_0 : i32, i32
  }
  func.func @transform_9(%arg0: i32) -> (i32, i32) {
    %c0_i32 = arith.constant 0 : i32
    %c0_i32_0 = arith.constant 0 : i32
    return %arg0, %c0_i32 : i32, i32
  }
}

</mosaic_0001>

<bundles_post_ra>
// kernel: tile.33
= control target key start
LH: loop header
LB: loop body
LE: loop exit
PB: predicated region body
PF: predicated region fallthrough
CT: control target
= control target key end

     0   :  { %s22_s0 = inlined_call_operand.vmem [shape: f32[32], index: 0, kind: input, shape index: {}]   ;;  %s23_s1 = inlined_call_operand.vmem [shape: f32[8,32], index: 1, kind: output, shape index: {}]  }
   0x1   :  { %v4_v0 = vld [vmem:[%s22_s0] ss:$0 sm:$0xff] }
   0x2   :  { %5 = vst [vmem:[%s23_s1] sm:$0xff] %v4_v0 }

// kernel: tile.34
= control target key start
LH: loop header
LB: loop body
LE: loop exit
PB: predicated region body
PF: predicated region fallthrough
CT: control target
= control target key end

     0   :  { %s7_s6 = smov 3  ;;  %s14_s9 = smov 3  ;;  %vm4_vm0 = vcmask 261120   ;;  %vm11_vm1 = vcmask 1048320   ;;  %vm18_vm2 = vcmask 785920   ;;  %vm25_vm3 = vcmask 523520   ;;  %s76_s0 = inlined_call_operand.vmem [shape: f32[8,32], index: 0, kind: input, shape index: {}]   ;;  %s77_s1 = inlined_call_operand.vmem [shape: f32[1,256], index: 1, kind: output, shape index: {}]  }
   0x1   :  { %v38_v0 = vld [vmem:[%s76_s0 + $0x3] ss:$4 sm:%s7_s6]   ;;  %s45_s10 = smov 96   ;;  %s21_s11 = smov 3  ;;  %v39_v1 = vld [vmem:[%s76_s0 + $0x2] ss:$4 sm:%s14_s9]  }
   0x2   :  { %9 = vrot.lane.b32.xlu0 %v38_v0, %s45_s10  ;;  %v40_v2 = vld [vmem:[%s76_s0 + $0x1] ss:$4 sm:%s21_s11]   ;;  %s2_s16 = smov 3  ;;  %s46_s17 = smov 32  }
   0x3   :  { %23 = vrot.lane.b32.xlu1 %v40_v2, %s46_s17  ;;  %v3_v3 = vld [vmem:[%s76_s0] ss:$4 sm:%s2_s16]   ;;  %s47_s0 = smov 64  }
   0x4   :  { %5 = vst.msk [vmem:[#allocation0] ss:$8 sm:$0x3] %vm4_vm0, %v3_v3  }
   0x6   :  { %16 = vrot.lane.b32.xlu0 %v39_v1, %s47_s0 }
  0x74   :  { %v10_v4 = vpop.permute.xlu0 %9  }
  0x75   :  { %12 = vst.msk [vmem:[#allocation0] ss:$8 sm:$0x3] %vm11_vm1, %v10_v4   ;;  %v24_v5 = vpop.permute.xlu1 %23  }
  0x78   :  { %v17_v6 = vpop.permute.xlu0 %16  }
  0x79   :  { %19 = vst.msk [vmem:[#allocation0] ss:$8 sm:$0x3] %vm18_vm2, %v17_v6  }
  0x7a   :  { %26 = vst.msk [vmem:[#allocation0] ss:$8 sm:$0x3] %vm25_vm3, %v24_v5  }
  0x81   :  { %v30_v7 = vld [vmem:[#allocation0] sm:$0x1]  ;;  %v34_v8 = vld [vmem:[#allocation0 + $0x8] sm:$0x1] }
  0x82   :  { %32 = vst [vmem:[%s77_s1] sm:$0x1] %v30_v7  ;;  %41 = vst [vmem:[%s77_s1 + $0x1] sm:$0x1] %v34_v8 }

// kernel: tile.29
= control target key start
LH: loop header
LB: loop body
LE: loop exit
PB: predicated region body
PF: predicated region fallthrough
CT: control target
= control target key end

     0   :  { %vm603_vm0 = vcmask 1047556   ;;  %vm514_vm1 = vcmask 261120   ;;  %s1156_s9 = smov 64   ;;  %s1157_s10 = smov 32   ;;  %vm607_vm2 = vcmask 1048320   ;;  %vm694_vm3 = vcmask 785920   ;;  %s1320_s0 = inlined_call_operand.vmem [shape: bf16[32,8,32], index: 0, kind: input, shape index: {}]   ;;  %s1321_s1 = inlined_call_operand.vmem [shape: bf16[32,256], index: 1, kind: output, shape index: {}]  }
   0x1   :  { %v1078_v0 = vld [vmem:[%s1320_s0 + $0x58] sm:$0xff]   ;;  %v1079_v1 = vld [vmem:[%s1320_s0 + $0x50] sm:$0xff]   ;;  %v1080_v2 = vld [vmem:[%s1320_s0 + $0x48] sm:$0xff]   ;;  %vm781_vm4 = vcmask 523520  }
   0x2   :  { %v1008_v3 = vunpack.c.l.bf16 %v1078_v0  ;;  %v1009_v4 = vunpack.c.h.bf16 %v1078_v0  ;;  %v1012_v5 = vunpack.c.l.bf16 %v1079_v1  ;;  %v1013_v6 = vunpack.c.h.bf16 %v1079_v1  ;;  %v1081_v7 = vld [vmem:[%s1320_s0 + $0x40] sm:$0xff]   ;;  %v1086_v8 = vld [vmem:[%s1320_s0 + $0x18] sm:$0xff]   ;;  %v1087_v9 = vld [vmem:[%s1320_s0 + $0x10] sm:$0xff]  }
   0x3   :  { %v1016_v10 = vunpack.c.l.bf16 %v1080_v2  ;;  %v1017_v11 = vunpack.c.h.bf16 %v1080_v2  ;;  %v1020_v12 = vunpack.c.l.bf16 %v1081_v7  ;;  %v1021_v13 = vunpack.c.h.bf16 %v1081_v7  ;;  %v1088_v14 = vld [vmem:[%s1320_s0 + $0x8] sm:$0xff]   ;;  %v1051_v15 = vld [vmem:[%s1320_s0] sm:$0xff]   ;;  %v1074_v16 = vld [vmem:[%s1320_s0 + $0x78] sm:$0xff]  }
   0x4   :  { %148 = vst [vmem:[#allocation1 + $0xb8] sm:$0xff] %v1009_v4  ;;  %164 = vst [vmem:[#allocation1 + $0xb0] sm:$0xff] %v1008_v3  ;;  %v1040_v17 = vunpack.c.l.bf16 %v1086_v8  ;;  %v1041_v18 = vunpack.c.h.bf16 %v1086_v8  ;;  %v1044_v19 = vunpack.c.l.bf16 %v1087_v9  ;;  %v1045_v20 = vunpack.c.h.bf16 %v1087_v9  ;;  %v1075_v21 = vld [vmem:[%s1320_s0 + $0x70] sm:$0xff]   ;;  %v1076_v22 = vld [vmem:[%s1320_s0 + $0x68] sm:$0xff]  }
   0x5   :  { %180 = vst [vmem:[#allocation1 + $0xa8] sm:$0xff] %v1013_v6  ;;  %196 = vst [vmem:[#allocation1 + $0xa0] sm:$0xff] %v1012_v5  ;;  %v1077_v23 = vld [vmem:[%s1320_s0 + $0x60] sm:$0xff]   ;;  %v1048_v24 = vunpack.c.l.bf16 %v1088_v14  ;;  %v1049_v25 = vunpack.c.h.bf16 %v1088_v14  ;;  %v1052_v26 = vunpack.c.l.bf16 %v1051_v15  ;;  %v1053_v27 = vunpack.c.h.bf16 %v1051_v15  ;;  %v1082_v28 = vld [vmem:[%s1320_s0 + $0x38] sm:$0xff]  }
   0x6   :  { %212 = vst [vmem:[#allocation1 + $0x98] sm:$0xff] %v1017_v11  ;;  %228 = vst [vmem:[#allocation1 + $0x90] sm:$0xff] %v1016_v10  ;;  %v1083_v29 = vld [vmem:[%s1320_s0 + $0x30] sm:$0xff]   ;;  %v992_v30 = vunpack.c.l.bf16 %v1074_v16  ;;  %v993_v31 = vunpack.c.h.bf16 %v1074_v16  ;;  %v996_v32 = vunpack.c.l.bf16 %v1075_v21  ;;  %v997_v33 = vunpack.c.h.bf16 %v1075_v21  ;;  %v1084_v34 = vld [vmem:[%s1320_s0 + $0x28] sm:$0xff]  }
   0x7   :  { %244 = vst [vmem:[#allocation1 + $0x88] sm:$0xff] %v1021_v13  ;;  %260 = vst [vmem:[#allocation1 + $0x80] sm:$0xff] %v1020_v12  ;;  %v1085_v35 = vld [vmem:[%s1320_s0 + $0x20] sm:$0xff]   ;;  %v1000_v36 = vunpack.c.l.bf16 %v1076_v22  ;;  %v1001_v37 = vunpack.c.h.bf16 %v1076_v22  ;;  %v1004_v38 = vunpack.c.l.bf16 %v1077_v23  ;;  %v1005_v39 = vunpack.c.h.bf16 %v1077_v23  ;;  %s1155_s0 = smov 96  }
   0x8   :  { %404 = vst [vmem:[#allocation1 + $0x38] sm:$0xff] %v1041_v18  ;;  %420 = vst [vmem:[#allocation1 + $0x30] sm:$0xff] %v1040_v17  ;;  %v1024_v40 = vunpack.c.l.bf16 %v1082_v28  ;;  %v1025_v41 = vunpack.c.h.bf16 %v1082_v28  ;;  %v1028_v42 = vunpack.c.l.bf16 %v1083_v29  ;;  %v1029_v43 = vunpack.c.h.bf16 %v1083_v29 }
   0x9   :  { %436 = vst [vmem:[#allocation1 + $0x28] sm:$0xff] %v1045_v20  ;;  %452 = vst [vmem:[#allocation1 + $0x20] sm:$0xff] %v1044_v19  ;;  %v1032_v44 = vunpack.c.l.bf16 %v1084_v34  ;;  %v1033_v45 = vunpack.c.h.bf16 %v1084_v34  ;;  %v1036_v46 = vunpack.c.l.bf16 %v1085_v35  ;;  %v1037_v47 = vunpack.c.h.bf16 %v1085_v35 }
   0xa   :  { %468 = vst [vmem:[#allocation1 + $0x18] sm:$0xff] %v1049_v25  ;;  %484 = vst [vmem:[#allocation1 + $0x10] sm:$0xff] %v1048_v24 }
   0xb   :  { %499 = vst [vmem:[#allocation1 + $0x8] sm:$0xff] %v1053_v27  ;;  %512 = vst [vmem:[#allocation1] sm:$0xff] %v1052_v26 }
   0xc   :  { %20 = vst [vmem:[#allocation1 + $0xf8] sm:$0xff] %v993_v31  ;;  %36 = vst [vmem:[#allocation1 + $0xf0] sm:$0xff] %v992_v30  ;;  %v612_v48 = vld [vmem:[#allocation1 + $0x83] ss:$8 sm:$0xf0]  }
   0xd   :  { %52 = vst [vmem:[#allocation1 + $0xe8] sm:$0xff] %v997_v33  ;;  %68 = vst [vmem:[#allocation1 + $0xe0] sm:$0xff] %v996_v32  ;;  %v634_v49 = vld [vmem:[#allocation1 + $0x87] ss:$8 sm:$0xf0]  }
   0xe   :  { %84 = vst [vmem:[#allocation1 + $0xd8] sm:$0xff] %v1001_v37  ;;  %100 = vst [vmem:[#allocation1 + $0xd0] sm:$0xff] %v1000_v36  ;;  %v610_v50 = vld [vmem:[#allocation1 + $0x83] ss:$8 sm:$0xf]  }
   0xf   :  { %116 = vst [vmem:[#allocation1 + $0xc8] sm:$0xff] %v1005_v39  ;;  %132 = vst [vmem:[#allocation1 + $0xc0] sm:$0xff] %v1004_v38  ;;  %v632_v51 = vld [vmem:[#allocation1 + $0x87] ss:$8 sm:$0xf]   ;;  %v614_v53 = vsel %vm603_vm0, %v612_v48, %v610_v50 }
  0x10   :  { %276 = vst [vmem:[#allocation1 + $0x78] sm:$0xff] %v1025_v41  ;;  %292 = vst [vmem:[#allocation1 + $0x70] sm:$0xff] %v1024_v40  ;;  %v602_v52 = vld [vmem:[#allocation1 + $0x3] ss:$8 sm:$0xf0]   ;;  %v636_v60 = vsel %vm603_vm0, %v634_v49, %v632_v51 }
  0x11   :  { %308 = vst [vmem:[#allocation1 + $0x68] sm:$0xff] %v1029_v43  ;;  %324 = vst [vmem:[#allocation1 + $0x60] sm:$0xff] %v1028_v42  ;;  %v623_v54 = vld [vmem:[#allocation1 + $0x7] ss:$8 sm:$0xf0]  }
  0x12   :  { %340 = vst [vmem:[#allocation1 + $0x58] sm:$0xff] %v1033_v45  ;;  %356 = vst [vmem:[#allocation1 + $0x50] sm:$0xff] %v1032_v44  ;;  %v600_v55 = vld [vmem:[#allocation1 + $0x3] ss:$8 sm:$0xf]  }
  0x13   :  { %372 = vst [vmem:[#allocation1 + $0x48] sm:$0xff] %v1037_v47  ;;  %388 = vst [vmem:[#allocation1 + $0x40] sm:$0xff] %v1036_v46  ;;  %v621_v56 = vld [vmem:[#allocation1 + $0x7] ss:$8 sm:$0xf]   ;;  %v604_v57 = vsel %vm603_vm0, %v602_v52, %v600_v55 }
  0x14   :  { %v656_v58 = vld [vmem:[#allocation1 + $0xc3] ss:$8 sm:$0xf0]   ;;  %v625_v59 = vsel %vm603_vm0, %v623_v54, %v621_v56  ;;  %v678_v61 = vld [vmem:[#allocation1 + $0xc7] ss:$8 sm:$0xf0]   ;;  %v1095_v62 = vpack.i.bf16 %v614_v53, %v604_v57 }
  0x15   :  { %v1100_v5 = vpack.i.bf16 %v636_v60, %v625_v59  ;;  %v687_v10 = vld [vmem:[#allocation1 + $0x2] ss:$8 sm:$0xf]   ;;  %v708_v17 = vld [vmem:[#allocation1 + $0x6] ss:$8 sm:$0xf]  }
  0x16   :  { %v654_v63 = vld [vmem:[#allocation1 + $0xc3] ss:$8 sm:$0xf]   ;;  %v676_v0 = vld [vmem:[#allocation1 + $0xc7] ss:$8 sm:$0xf]   ;;  %1096 = vrot.lane.b32.xlu0 %v1095_v62, %s1155_s0 }
  0x17   :  { %v658_v2 = vsel %vm603_vm0, %v656_v58, %v654_v63  ;;  %v680_v9 = vsel %vm603_vm0, %v678_v61, %v676_v0  ;;  %v689_v11 = vld [vmem:[#allocation1 + $0x2] ss:$8 sm:$0xf0]   ;;  %v710_v18 = vld [vmem:[#allocation1 + $0x6] ss:$8 sm:$0xf0]  }
  0x18   :  { %v645_v1 = vld [vmem:[#allocation1 + $0x43] ss:$8 sm:$0xf0]   ;;  %v667_v3 = vld [vmem:[#allocation1 + $0x47] ss:$8 sm:$0xf0]   ;;  %v691_v13 = vsel %vm603_vm0, %v689_v11, %v687_v10  ;;  %v712_v23 = vsel %vm603_vm0, %v710_v18, %v708_v17 }
  0x19   :  { %v697_v14 = vld [vmem:[#allocation1 + $0x82] ss:$8 sm:$0xf]   ;;  %v719_v21 = vld [vmem:[#allocation1 + $0x86] ss:$8 sm:$0xf]  }
  0x1a   :  { %v643_v4 = vld [vmem:[#allocation1 + $0x43] ss:$8 sm:$0xf]   ;;  %v665_v6 = vld [vmem:[#allocation1 + $0x47] ss:$8 sm:$0xf]   ;;  %1101 = vrot.lane.b32.xlu0 %v1100_v5, %s1155_s0 }
  0x1b   :  { %v647_v7 = vsel %vm603_vm0, %v645_v1, %v643_v4  ;;  %v669_v8 = vsel %vm603_vm0, %v667_v3, %v665_v6  ;;  %v699_v15 = vld [vmem:[#allocation1 + $0x82] ss:$8 sm:$0xf0]   ;;  %v721_v22 = vld [vmem:[#allocation1 + $0x86] ss:$8 sm:$0xf0]  }
  0x1c   :  { %v1105_v12 = vpack.i.bf16 %v658_v2, %v647_v7  ;;  %v701_v16 = vsel %vm603_vm0, %v699_v15, %v697_v14  ;;  %v1110_v19 = vpack.i.bf16 %v680_v9, %v669_v8  ;;  %v723_v24 = vsel %vm603_vm0, %v721_v22, %v719_v21  ;;  %v730_v25 = vld [vmem:[#allocation1 + $0x42] ss:$8 sm:$0xf]   ;;  %v752_v31 = vld [vmem:[#allocation1 + $0x46] ss:$8 sm:$0xf]  }
  0x1d   :  { %v1115_v20 = vpack.i.bf16 %v701_v16, %v691_v13  ;;  %v732_v26 = vld [vmem:[#allocation1 + $0x42] ss:$8 sm:$0xf0]   ;;  %v754_v32 = vld [vmem:[#allocation1 + $0x46] ss:$8 sm:$0xf0]   ;;  %v1120_v33 = vpack.i.bf16 %v723_v24, %v712_v23 }
  0x1e   :  { %1106 = vrot.lane.b32.xlu1 %v1105_v12, %s1155_s0  ;;  %v734_v27 = vsel %vm603_vm0, %v732_v26, %v730_v25  ;;  %v741_v28 = vld [vmem:[#allocation1 + $0xc2] ss:$8 sm:$0xf]   ;;  %v763_v35 = vld [vmem:[#allocation1 + $0xc6] ss:$8 sm:$0xf]   ;;  %v756_v37 = vsel %vm603_vm0, %v754_v32, %v752_v31 }
  0x1f   :  { %v743_v29 = vld [vmem:[#allocation1 + $0xc2] ss:$8 sm:$0xf0]   ;;  %1116 = vrot.lane.b32.xlu0 %v1115_v20, %s1156_s9  ;;  %v765_v36 = vld [vmem:[#allocation1 + $0xc6] ss:$8 sm:$0xf0]  }
  0x20   :  { %v745_v30 = vsel %vm603_vm0, %v743_v29, %v741_v28  ;;  %v767_v38 = vsel %vm603_vm0, %v765_v36, %v763_v35  ;;  %v774_v39 = vld [vmem:[#allocation1 + $0x1] ss:$8 sm:$0xf]   ;;  %v795_v45 = vld [vmem:[#allocation1 + $0x5] ss:$8 sm:$0xf]  }
  0x21   :  { %v1125_v34 = vpack.i.bf16 %v745_v30, %v734_v27  ;;  %v776_v40 = vld [vmem:[#allocation1 + $0x1] ss:$8 sm:$0xf0]   ;;  %v797_v46 = vld [vmem:[#allocation1 + $0x5] ss:$8 sm:$0xf0]   ;;  %v1130_v47 = vpack.i.bf16 %v767_v38, %v756_v37 }
  0x22   :  { %1111 = vrot.lane.b32.xlu1 %v1110_v19, %s1155_s0  ;;  %v778_v41 = vsel %vm603_vm0, %v776_v40, %v774_v39  ;;  %v784_v42 = vld [vmem:[#allocation1 + $0x81] ss:$8 sm:$0xf]   ;;  %v806_v49 = vld [vmem:[#allocation1 + $0x85] ss:$8 sm:$0xf]   ;;  %v799_v51 = vsel %vm603_vm0, %v797_v46, %v795_v45 }
  0x23   :  { %v786_v43 = vld [vmem:[#allocation1 + $0x81] ss:$8 sm:$0xf0]   ;;  %1126 = vrot.lane.b32.xlu0 %v1125_v34, %s1156_s9  ;;  %v808_v50 = vld [vmem:[#allocation1 + $0x85] ss:$8 sm:$0xf0]  }
  0x24   :  { %v788_v44 = vsel %vm603_vm0, %v786_v43, %v784_v42  ;;  %v810_v52 = vsel %vm603_vm0, %v808_v50, %v806_v49  ;;  %v817_v53 = vld [vmem:[#allocation1 + $0x41] ss:$8 sm:$0xf]   ;;  %v839_v59 = vld [vmem:[#allocation1 + $0x45] ss:$8 sm:$0xf]  }
  0x25   :  { %v1135_v48 = vpack.i.bf16 %v788_v44, %v778_v41  ;;  %v819_v54 = vld [vmem:[#allocation1 + $0x41] ss:$8 sm:$0xf0]   ;;  %v841_v60 = vld [vmem:[#allocation1 + $0x45] ss:$8 sm:$0xf0]   ;;  %v1140_v61 = vpack.i.bf16 %v810_v52, %v799_v51 }
  0x26   :  { %1121 = vrot.lane.b32.xlu1 %v1120_v33, %s1156_s9  ;;  %v821_v55 = vsel %vm603_vm0, %v819_v54, %v817_v53  ;;  %v828_v56 = vld [vmem:[#allocation1 + $0xc1] ss:$8 sm:$0xf]   ;;  %v850_v63 = vld [vmem:[#allocation1 + $0xc5] ss:$8 sm:$0xf]   ;;  %v843_v1 = vsel %vm603_vm0, %v841_v60, %v839_v59 }
  0x27   :  { %v830_v57 = vld [vmem:[#allocation1 + $0xc1] ss:$8 sm:$0xf0]   ;;  %1136 = vrot.lane.b32.xlu0 %v1135_v48, %s1157_s10  ;;  %v852_v0 = vld [vmem:[#allocation1 + $0xc5] ss:$8 sm:$0xf0]  }
  0x28   :  { %v832_v58 = vsel %vm603_vm0, %v830_v57, %v828_v56  ;;  %v854_v2 = vsel %vm603_vm0, %v852_v0, %v850_v63  ;;  %v513_v3 = vld [vmem:[#allocation1] ss:$4 sm:$0xff]  }
  0x29   :  { %v1145_v62 = vpack.i.bf16 %v832_v58, %v821_v55  ;;  %v523_v4 = vld [vmem:[#allocation1 + $0x20] ss:$4 sm:$0xff]   ;;  %515 = vst.msk [vmem:[#allocation0] ss:$8 sm:$0x3] %vm514_vm1, %v513_v3   ;;  %v1150_v11 = vpack.i.bf16 %v854_v2, %v843_v1 }
  0x2a   :  { %1131 = vrot.lane.b32.xlu1 %v1130_v47, %s1156_s9  ;;  %v556_v5 = vld [vmem:[#allocation1 + $0x80] ss:$4 sm:$0xff]   ;;  %517 = vst.msk [vmem:[#allocation0 - $0xf] ss:$8 sm:$0xc] %vm514_vm1, %v513_v3  }
  0x2b   :  { %519 = vst.msk [vmem:[#allocation0 - $0x1e] ss:$8 sm:$0x30] %vm514_vm1, %v513_v3   ;;  %521 = vst.msk [vmem:[#allocation0 - $0x2d] ss:$8 sm:$0xc0] %vm514_vm1, %v513_v3   ;;  %1146 = vrot.lane.b32.xlu0 %v1145_v62, %s1157_s10 }
  0x2c   :  { %526 = vst.msk [vmem:[#allocation0 + $0x4] ss:$8 sm:$0x3] %vm514_vm1, %v523_v4   ;;  %528 = vst.msk [vmem:[#allocation0 - $0xb] ss:$8 sm:$0xc] %vm514_vm1, %v523_v4  }
  0x2d   :  { %530 = vst.msk [vmem:[#allocation0 - $0x1a] ss:$8 sm:$0x30] %vm514_vm1, %v523_v4   ;;  %532 = vst.msk [vmem:[#allocation0 - $0x29] ss:$8 sm:$0xc0] %vm514_vm1, %v523_v4  }
  0x2e   :  { %559 = vst.msk [vmem:[#allocation0 + $0x20] ss:$8 sm:$0x3] %vm514_vm1, %v556_v5   ;;  %561 = vst.msk [vmem:[#allocation0 + $0x11] ss:$8 sm:$0xc] %vm514_vm1, %v556_v5   ;;  %1141 = vrot.lane.b32.xlu1 %v1140_v61, %s1157_s10 }
  0x2f   :  { %563 = vst.msk [vmem:[#allocation0 + $0x2] ss:$8 sm:$0x30] %vm514_vm1, %v556_v5   ;;  %565 = vst.msk [vmem:[#allocation0 - $0xd] ss:$8 sm:$0xc0] %vm514_vm1, %v556_v5  }
  0x30   :  { %v567_v6 = vld [vmem:[#allocation1 + $0xa0] ss:$4 sm:$0xff]  }
  0x31   :  { %v534_v7 = vld [vmem:[#allocation1 + $0x40] ss:$4 sm:$0xff]   ;;  %570 = vst.msk [vmem:[#allocation0 + $0x24] ss:$8 sm:$0x3] %vm514_vm1, %v567_v6  }
  0x32   :  { %572 = vst.msk [vmem:[#allocation0 + $0x15] ss:$8 sm:$0xc] %vm514_vm1, %v567_v6   ;;  %574 = vst.msk [vmem:[#allocation0 + $0x6] ss:$8 sm:$0x30] %vm514_vm1, %v567_v6   ;;  %1151 = vrot.lane.b32.xlu1 %v1150_v11, %s1157_s10 }
  0x33   :  { %576 = vst.msk [vmem:[#allocation0 - $0x9] ss:$8 sm:$0xc0] %vm514_vm1, %v567_v6   ;;  %537 = vst.msk [vmem:[#allocation0 + $0x10] ss:$8 sm:$0x3] %vm514_vm1, %v534_v7  }
  0x34   :  { %539 = vst.msk [vmem:[#allocation0 + $0x1] ss:$8 sm:$0xc] %vm514_vm1, %v534_v7   ;;  %541 = vst.msk [vmem:[#allocation0 - $0xe] ss:$8 sm:$0x30] %vm514_vm1, %v534_v7  }
  0x35   :  { %543 = vst.msk [vmem:[#allocation0 - $0x1d] ss:$8 sm:$0xc0] %vm514_vm1, %v534_v7   ;;  %v545_v8 = vld [vmem:[#allocation1 + $0x60] ss:$4 sm:$0xff]  }
  0x36   :  { %v578_v9 = vld [vmem:[#allocation1 + $0xc0] ss:$4 sm:$0xff]   ;;  %548 = vst.msk [vmem:[#allocation0 + $0x14] ss:$8 sm:$0x3] %vm514_vm1, %v545_v8  }
  0x37   :  { %v589_v10 = vld [vmem:[#allocation1 + $0xe0] ss:$4 sm:$0xff]   ;;  %550 = vst.msk [vmem:[#allocation0 + $0x5] ss:$8 sm:$0xc] %vm514_vm1, %v545_v8  }
  0x38   :  { %552 = vst.msk [vmem:[#allocation0 - $0xa] ss:$8 sm:$0x30] %vm514_vm1, %v545_v8   ;;  %554 = vst.msk [vmem:[#allocation0 - $0x19] ss:$8 sm:$0xc0] %vm514_vm1, %v545_v8  }
  0x39   :  { %581 = vst.msk [vmem:[#allocation0 + $0x30] ss:$8 sm:$0x3] %vm514_vm1, %v578_v9   ;;  %583 = vst.msk [vmem:[#allocation0 + $0x21] ss:$8 sm:$0xc] %vm514_vm1, %v578_v9  }
  0x3a   :  { %585 = vst.msk [vmem:[#allocation0 + $0x12] ss:$8 sm:$0x30] %vm514_vm1, %v578_v9   ;;  %587 = vst.msk [vmem:[#allocation0 + $0x3] ss:$8 sm:$0xc0] %vm514_vm1, %v578_v9  }
  0x3b   :  { %592 = vst.msk [vmem:[#allocation0 + $0x34] ss:$8 sm:$0x3] %vm514_vm1, %v589_v10   ;;  %594 = vst.msk [vmem:[#allocation0 + $0x25] ss:$8 sm:$0xc] %vm514_vm1, %v589_v10  }
  0x3c   :  { %596 = vst.msk [vmem:[#allocation0 + $0x16] ss:$8 sm:$0x30] %vm514_vm1, %v589_v10   ;;  %598 = vst.msk [vmem:[#allocation0 + $0x7] ss:$8 sm:$0xc0] %vm514_vm1, %v589_v10  }
  0x88   :  { %v1097_v12 = vpop.permute.xlu0 %1096 }
  0x89   :  { %v1099_v13 = vunpack.i.h.bf16 %v1097_v12  ;;  %v1098_v14 = vunpack.i.l.bf16 %v1097_v12 }
  0x8b   :  { %608 = vst.msk [vmem:[#allocation0] sm:$0xff] %vm607_vm2, %v1098_v14   ;;  %619 = vst.msk [vmem:[#allocation0 + $0x20] sm:$0xff] %vm607_vm2, %v1099_v13  }
  0x8c   :  { %v1102_v16 = vpop.permute.xlu0 %1101 }
  0x8d   :  { %v1104_v19 = vunpack.i.h.bf16 %v1102_v16  ;;  %v1103_v20 = vunpack.i.l.bf16 %v1102_v16 }
  0x8f   :  { %630 = vst.msk [vmem:[#allocation0 + $0x8] sm:$0xff] %vm607_vm2, %v1103_v20   ;;  %641 = vst.msk [vmem:[#allocation0 + $0x28] sm:$0xff] %vm607_vm2, %v1104_v19  }
  0x90   :  { %v1107_v15 = vpop.permute.xlu1 %1106 }
  0x91   :  { %v1109_v17 = vunpack.i.h.bf16 %v1107_v15  ;;  %v1108_v18 = vunpack.i.l.bf16 %v1107_v15  ;;  %v1117_v22 = vpop.permute.xlu0 %1116 }
  0x92   :  { %v1119_v25 = vunpack.i.h.bf16 %v1117_v22  ;;  %v1118_v26 = vunpack.i.l.bf16 %v1117_v22 }
  0x93   :  { %652 = vst.msk [vmem:[#allocation0 + $0x10] sm:$0xff] %vm607_vm2, %v1108_v18   ;;  %663 = vst.msk [vmem:[#allocation0 + $0x30] sm:$0xff] %vm607_vm2, %v1109_v17  }
  0x94   :  { %v1112_v21 = vpop.permute.xlu1 %1111  ;;  %695 = vst.msk [vmem:[#allocation0] sm:$0xff] %vm694_vm3, %v1118_v26   ;;  %706 = vst.msk [vmem:[#allocation0 + $0x20] sm:$0xff] %vm694_vm3, %v1119_v25  }
  0x95   :  { %v1114_v23 = vunpack.i.h.bf16 %v1112_v21  ;;  %v1113_v24 = vunpack.i.l.bf16 %v1112_v21  ;;  %v1127_v28 = vpop.permute.xlu0 %1126 }
  0x96   :  { %v1129_v31 = vunpack.i.h.bf16 %v1127_v28  ;;  %v1128_v32 = vunpack.i.l.bf16 %v1127_v28 }
  0x97   :  { %674 = vst.msk [vmem:[#allocation0 + $0x18] sm:$0xff] %vm607_vm2, %v1113_v24   ;;  %685 = vst.msk [vmem:[#allocation0 + $0x38] sm:$0xff] %vm607_vm2, %v1114_v23  }
  0x98   :  { %v1122_v27 = vpop.permute.xlu1 %1121  ;;  %739 = vst.msk [vmem:[#allocation0 + $0x10] sm:$0xff] %vm694_vm3, %v1128_v32   ;;  %750 = vst.msk [vmem:[#allocation0 + $0x30] sm:$0xff] %vm694_vm3, %v1129_v31  }
  0x99   :  { %v1124_v29 = vunpack.i.h.bf16 %v1122_v27  ;;  %v1123_v30 = vunpack.i.l.bf16 %v1122_v27  ;;  %v1137_v34 = vpop.permute.xlu0 %1136 }
  0x9a   :  { %v1139_v37 = vunpack.i.h.bf16 %v1137_v34  ;;  %v1138_v38 = vunpack.i.l.bf16 %v1137_v34 }
  0x9b   :  { %728 = vst.msk [vmem:[#allocation0 + $0x28] sm:$0xff] %vm694_vm3, %v1124_v29   ;;  %717 = vst.msk [vmem:[#allocation0 + $0x8] sm:$0xff] %vm694_vm3, %v1123_v30  }
  0x9c   :  { %v1132_v33 = vpop.permute.xlu1 %1131  ;;  %793 = vst.msk [vmem:[#allocation0 + $0x20] sm:$0xff] %vm781_vm4, %v1139_v37   ;;  %782 = vst.msk [vmem:[#allocation0] sm:$0xff] %vm781_vm4, %v1138_v38  }
  0x9d   :  { %v1134_v35 = vunpack.i.h.bf16 %v1132_v33  ;;  %v1133_v36 = vunpack.i.l.bf16 %v1132_v33  ;;  %v1147_v40 = vpop.permute.xlu0 %1146 }
  0x9e   :  { %v1149_v43 = vunpack.i.h.bf16 %v1147_v40  ;;  %v1148_v44 = vunpack.i.l.bf16 %v1147_v40 }
  0x9f   :  { %761 = vst.msk [vmem:[#allocation0 + $0x18] sm:$0xff] %vm694_vm3, %v1133_v36   ;;  %772 = vst.msk [vmem:[#allocation0 + $0x38] sm:$0xff] %vm694_vm3, %v1134_v35  }
  0xa0   :  { %v1142_v39 = vpop.permute.xlu1 %1141  ;;  %826 = vst.msk [vmem:[#allocation0 + $0x10] sm:$0xff] %vm781_vm4, %v1148_v44   ;;  %837 = vst.msk [vmem:[#allocation0 + $0x30] sm:$0xff] %vm781_vm4, %v1149_v43  }
  0xa1   :  { %v1144_v41 = vunpack.i.h.bf16 %v1142_v39  ;;  %v1143_v42 = vunpack.i.l.bf16 %v1142_v39 }
  0xa3   :  { %804 = vst.msk [vmem:[#allocation0 + $0x8] sm:$0xff] %vm781_vm4, %v1143_v42   ;;  %815 = vst.msk [vmem:[#allocation0 + $0x28] sm:$0xff] %vm781_vm4, %v1144_v41   ;;  %v889_v48 = vld [vmem:[#allocation0 + $0x20] sm:$0xff] }
  0xa4   :  { %v1152_v45 = vpop.permute.xlu1 %1151  ;;  %v864_v49 = vld [vmem:[#allocation0] sm:$0xff] }
  0xa5   :  { %v1154_v46 = vunpack.i.h.bf16 %v1152_v45  ;;  %v1153_v47 = vunpack.i.l.bf16 %v1152_v45 }
  0xa7   :  { %848 = vst.msk [vmem:[#allocation0 + $0x18] sm:$0xff] %vm781_vm4, %v1153_v47   ;;  %859 = vst.msk [vmem:[#allocation0 + $0x38] sm:$0xff] %vm781_vm4, %v1154_v46   ;;  %v875_v54 = vld [vmem:[#allocation0 + $0x10] sm:$0xff] }
  0xa8   :  { %v903_v55 = vld [vmem:[#allocation0 + $0x30] sm:$0xff] }
  0xaa   :  { %v869_v50 = vld [vmem:[#allocation0 + $0x8] sm:$0xff] }
  0xab   :  { %v896_v51 = vld [vmem:[#allocation0 + $0x28] sm:$0xff]  ;;  %v1057_v52 = vpack.c.bf16 %v869_v50, %v864_v49 }
  0xac   :  { %v1067_v53 = vpack.c.bf16 %v896_v51, %v889_v48 }
  0xad   :  { %1058 = vst [vmem:[%s1321_s1] sm:$0xff] %v1057_v52  }
  0xae   :  { %1090 = vst [vmem:[%s1321_s1 + $0x10] sm:$0xff] %v1067_v53   ;;  %v882_v56 = vld [vmem:[#allocation0 + $0x18] sm:$0xff] }
  0xaf   :  { %v910_v57 = vld [vmem:[#allocation0 + $0x38] sm:$0xff]  ;;  %v1062_v58 = vpack.c.bf16 %v882_v56, %v875_v54 }
  0xb0   :  { %v1072_v59 = vpack.c.bf16 %v910_v57, %v903_v55 }
  0xb1   :  { %1089 = vst [vmem:[%s1321_s1 + $0x8] sm:$0xff] %v1062_v58  }
  0xb2   :  { %1091 = vst [vmem:[%s1321_s1 + $0x18] sm:$0xff] %v1072_v59  }

// kernel: multi_head_guidance_qk.2
= control target key start
LH: loop header
LB: loop body
LE: loop exit
PB: predicated region body
PF: predicated region fallthrough
CT: control target
= control target key end

     0   :  { %9 = vsyncpa [#allocation3], 0  ;;  %s1435_s0 = inlined_call_operand.hbm [shape: f32[256,32], index: 0, kind: input, shape index: {}]   ;;  %s1436_s1 = inlined_call_operand.hbm [shape: f32[256,32], index: 1, kind: input, shape index: {}]   ;;  %s1437_s2 = inlined_call_operand.vmem [shape: f32[2,64,32], index: 2, kind: output, shape index: {0}]   ;;  %s1438_s3 = inlined_call_operand.vmem [shape: f32[2,16,32], index: 3, kind: output, shape index: {1}]  }
   0x1   :  { %11 = vsyncpa [#allocation3 + $0x1], 0 }
   0x2   :  { %12 = vsyncpa [#allocation5], 0 }
   0x3   :  { %14 = vsyncpa [#allocation5 + $0x1], 0  ;;  %s1054_s12 = smov 0   ;;  %s1056_s13 = smov 0  }
   0x4   :  { %s1058_s14 = smov 0   ;;  %s1060_s15 = smov 0  }
   0x5   :  { %s1062_s16 = smov 0   ;;  %s1064_s17 = smov 0  }
   0x6 LB: > { %s705_s18 = sadd.s32 4294967295, %s1025_s17   ;;  %s32_s19 = sadd.s32 1, %s1021_s16  ;;  %s1025_s17 = sphi %s1064_s17, %s20_s17   ;;  %s1021_s16 = sphi %s1062_s16, %s1449_s16   ;;  %s1017_s15 = sphi %s1060_s15, %s1448_s15   ;;  %s1013_s14 = sphi %s1058_s14, %s1447_s14   ;;  %s1009_s13 = sphi %s1056_s13, %s1446_s13   ;;  %s1005_s12 = sphi %s1054_s12, %s1445_s12  }
   0x7   : > { %p34_p0 = scmp.ge.s32.totalorder %s32_s19, 2  ;;  %s41_s20 = sadd.s32 1, %s1013_s14 }
   0x8   : > { %p48_p1 = scmp.ne.s32.totalorder %s1013_s14, %s1009_s13  ;;  %p49_p2 = scmp.eq.s32.totalorder %s1025_s17, 0 }
   0x9   : > { %s1451_s19 = smov (%p34_p0, %s32_s19), 0  ;;  %p54_p4 = scmp.ne.s32.totalorder %s1009_s13, %s1005_s12 }
   0xa   : > { %p1090_p3 = por %p49_p2, %p48_p1  ;;  %s38_s22 = ssub.s32 %s1021_s16, %s1451_s19 }
   0xb   : > { %p55_p5 = scmp.eq.s32.totalorder %s705_s18, 0  ;;  %p39_p6 = scmp.eq.s32.totalorder %s38_s22, 0 }
   0xc   : > { %p857_p8 = scmp.lt.s32.totalorder %s1025_s17, 2  ;;  %s1106_s25 = sand.u32 1, %s1013_s14  }
   0xd   : > { %p1097_p7 = por %p55_p5, %p54_p4  ;;  %s724_s26 = sshll.u32 %s1021_s16, 11 }
   0xe   : > { %s1103_s24 = scalar_select %p39_p6, %s1013_s14, %s41_s20  }
   0xf   : > { %s1441_s23 = scalar_select %p1097_p7, 1, 0 }
  0x10   : > { %s709_s27 = sshll.u32 %s1106_s25, 7  ;;  %s1115_s30 = scalar_lea.hbm %s1435_s0, %s724_s26 }
  0x11   : > { %s162_s4 = scalar_lea.vmem [#allocation2], %s709_s27  ;;  %p1121_p9 = pnand %p857_p8, %p1090_p3 }
  0x12   : > { %s170_s5 = sshll.u32 %s162_s4, 4  ;;  %s159_s7 = scalar_lea.sflag [#allocation3], %s1106_s25  ;;  %s1125_s5 = int_to_ptr.vmem [resolvable:$true] %s170_s5 }
  0x13   : > { %s911_s8 = scalar_lea.hbm %s1115_s30, 2048  ;;  %p913_p11 = pneg %p1121_p9 }
  0x14   : > { %p912_p10 = scmp.ne.s32.totalorder %s1115_s30, %s911_s8  ;;  %s916_s11 = scalar_lea.hbm %s1435_s0, 4096 }
  0x15   : > { %p917_p0 = scmp.lt.u32.totalorder %s1115_s30, %s1435_s0  ;;  %p918_p1 = scmp.lt.u32.totalorder %s916_s11, %s911_s8 }
  0x16   : > { %p914_p12 = pnand %p913_p11, %p912_p10  ;;  %p920_p3 = scmp.lt.u32.totalorder %s911_s8, %s1115_s30 }
  0x17   : > { %p919_p2 = por %p918_p1, %p917_p0 }
  0x18   : > { %p915_p13 = pneg %p914_p12 }
  0x19   : > { %p921_p4 = por %p920_p3, %p919_p2 }
  0x1b   : > { %p922_p5 = pnand %p921_p4, %p915_p13 }
  0x1d   : > { %925 = shalt.err (!%p922_p5)
}
  0x1e   : > { %s926_s20 = scalar_lea.vmem %s1125_s5, 2048  ;;  %s1027_s21 = smov [#allocation2]  }
  0x1f   : > { %p927_p6 = scmp.ne.s32.totalorder %s1125_s5, %s926_s20  ;;  %s931_s22 = sshll.u32 %s1027_s21, 4  ;;  %s932_s22 = int_to_ptr.vmem [resolvable:$false] %s931_s22 }
  0x20   : > { %s933_s28 = scalar_lea.vmem %s932_s22, 4096  ;;  %p934_p12 = scmp.lt.s32.totalorder %s1125_s5, %s932_s22 }
  0x21   : > { %p929_p8 = pnand %p927_p6, %p913_p11  ;;  %p935_p0 = scmp.lt.s32.totalorder %s933_s28, %s926_s20 }
  0x23   : > { %p930_p10 = pneg %p929_p8  ;;  %p936_p1 = por %p935_p0, %p934_p12 }
  0x25   : > { %p937_p2 = pnand %p936_p1, %p930_p10 }
  0x27   : > { %940 = shalt.err (!%p937_p2)
}
  0x28   : > { %s1028_s29 = smov 128   ;;  %s1029_s4 = smov 8  }
  0x29   : > { %853 = dma.hbm_to_vmem [thread:$0]  (!%p1121_p9), %s1115_s30, 2048, %s1125_s5, %s159_s7, %s1028_s29, %s1028_s29, %s1029_s4  }
  0x2a   : > { %p715_p13 = scmp.ge.s32.totalorder %s1025_s17, 1  ;;  %p200_p3 = scmp.lt.s32.totalorder %s1025_s17, 3 }
  0x2b   : > { %s1169_s11 = scalar_lea.hbm %s1436_s1, %s724_s26  ;;  %s184_s12 = scalar_lea.vmem [#allocation4], %s709_s27 }
  0x2c   : > { %p1160_p4 = pnand %p715_p13, %p200_p3  ;;  %s192_s18 = sshll.u32 %s184_s12, 4  ;;  %s1173_s18 = int_to_ptr.vmem [resolvable:$true] %s192_s18 }
  0x2d   : > { %s181_s30 = scalar_lea.sflag [#allocation5], %s1106_s25  ;;  %s941_s5 = scalar_lea.hbm %s1169_s11, 2048 }
  0x2e   : > { %p942_p5 = scmp.ne.s32.totalorder %s1169_s11, %s941_s5  ;;  %s946_s26 = scalar_lea.hbm %s1436_s1, 4096 }
  0x2f   : > { %p947_p10 = scmp.lt.u32.totalorder %s1169_s11, %s1436_s1  ;;  %p948_p12 = scmp.lt.u32.totalorder %s946_s26, %s941_s5 }
  0x30   : > { %p944_p6 = pnand %p942_p5, %p913_p11  ;;  %p950_p1 = scmp.lt.u32.totalorder %s941_s5, %s1169_s11 }
  0x31   : > { %p949_p0 = por %p948_p12, %p947_p10 }
  0x32   : > { %p945_p8 = pneg %p944_p6 }
  0x33   : > { %p951_p2 = por %p950_p1, %p949_p0 }
  0x35   : > { %p952_p13 = pnand %p951_p2, %p945_p8 }
  0x37   : > { %955 = shalt.err (!%p952_p13)
}
  0x38   : > { %s956_s27 = scalar_lea.vmem %s1173_s18, 2048  ;;  %s1030_s28 = smov [#allocation4]  }
  0x39   : > { %p957_p3 = scmp.ne.s32.totalorder %s1173_s18, %s956_s27  ;;  %s961_s9 = sshll.u32 %s1030_s28, 4  ;;  %s962_s9 = int_to_ptr.vmem [resolvable:$false] %s961_s9 }
  0x3a   : > { %s963_s10 = scalar_lea.vmem %s962_s9, 4096  ;;  %p964_p7 = scmp.lt.s32.totalorder %s1173_s18, %s962_s9 }
  0x3b   : > { %p959_p5 = pnand %p957_p3, %p913_p11  ;;  %p965_p10 = scmp.lt.s32.totalorder %s963_s10, %s956_s27 }
  0x3d   : > { %p960_p6 = pneg %p959_p5  ;;  %p966_p12 = por %p965_p10, %p964_p7 }
  0x3f   : > { %p967_p0 = pnand %p966_p12, %p960_p6 }
  0x41   : > { %970 = shalt.err (!%p967_p0)
}
  0x42   : > { %856 = dma.hbm_to_vmem [thread:$0]  (!%p1121_p9), %s1169_s11, 2048, %s1173_s18, %s181_s30, %s1028_s29, %s1028_s29, %s1029_s4  }
  0x43   : > { %204 = sbr.rel (%p1160_p4) target bundleno = 435 (0x1b3), region = 28  ;;  %s206_s12 = sand.u32 (!%p1160_p4), 1, %s1009_s13  }
  0x44   : > { %s716_s5 = sshll.u32 (!%p1160_p4), %s206_s12, 7  ;;  %s207_s7 = scalar_lea.sflag (!%p1160_p4), [#allocation3], %s206_s12 }
  0x45   : > { %s1207_s20 = scalar_lea.vmem (!%p1160_p4), [#allocation2], %s716_s5  ;;  %p1444_p7 = scmp.ne.s32.totalorder (!%p1160_p4), %s1441_s23, 0 }
  0x4a   : > { %996 = dma.done.wait (%p1444_p7), %s207_s7, 2048  }
  0x4b   : > { %998 = vsyncadd (%p1444_p7), %s207_s7, 4294965248  ;;  %s216_s25 = scalar_lea.sflag [#allocation5], %s206_s12  ;;  %s1213_s6 = scalar_lea.vmem [#allocation4], %s716_s5 }
  0x4c   : > { %1000 = dma.done.wait (%p1444_p7), %s216_s25, 2048  }
  0x4d   : > { %1002 = vsyncadd (%p1444_p7), %s216_s25, 4294965248  ;;  %v307_v0 = vld [vmem:[%s1213_s6] sm:$0xff]  ;;  %v308_v1 = vld [vmem:[%s1213_s6 + $0x8] sm:$0xff]  ;;  %p256_p9 = scmp.lt.s32.totalorder %s1017_s15, 1  ;;  %vm272_vm0 = vcmask 261120   ;;  %v1031_v40 = vmov 0.0  }
  0x4e   : > { %v283_v2 = vld [vmem:[%s1207_s20] sm:$0xff]  ;;  %v1222_v3 = vpack.c.bf16 %v308_v1, %v307_v0  ;;  %v284_v4 = vld [vmem:[%s1207_s20 + $0x8] sm:$0xff]  ;;  %v309_v5 = vld [vmem:[%s1213_s6 + $0x10] sm:$0xff]  ;;  %vm1032_vm1 = vmmov 0   ;;  %v1033_v53 = vmov 1065369472  }
  0x4f   : > { %v310_v6 = vld [vmem:[%s1213_s6 + $0x18] sm:$0xff]  ;;  %v1227_v7 = vpack.c.bf16 %v284_v4, %v283_v2  ;;  %v285_v8 = vld [vmem:[%s1207_s20 + $0x10] sm:$0xff]  ;;  %v311_v12 = vld [vmem:[%s1213_s6 + $0x20] sm:$0xff]  ;;  %s1453_s15 = smov (!%p256_p9, %s1017_s15), 1 }
  0x50   : > { %v286_v9 = vld [vmem:[%s1207_s20 + $0x18] sm:$0xff]  ;;  %413 = vxpose.xlu1.c.b16.start [1/8] (narrow) %v1222_v3, 32  ;;  %v1232_v10 = vpack.c.bf16 %v310_v6, %v309_v5  ;;  %786 = vmatprep.subr.bf16.mxu1 %v1222_v3  ;;  %v312_v13 = vld [vmem:[%s1213_s6 + $0x28] sm:$0xff]  ;;  %v287_v14 = vld [vmem:[%s1207_s20 + $0x20] sm:$0xff]  ;;  %s726_s23 = sshll.u32 %s1453_s15, 6  ;;  %s727_s11 = sshll.u32 %s1453_s15, 4 }
  0x51   : > { %335 = vxpose.xlu0.c.b16.start [1/8] (narrow) %v1227_v7, 32  ;;  %v1236_v11 = vpack.c.bf16 %v286_v9, %v285_v8  ;;  %766 = vmatprep.subr.bf16.mxu0 %v1227_v7  ;;  %v288_v15 = vld [vmem:[%s1207_s20 + $0x28] sm:$0xff]  ;;  %v1248_v16 = vpack.c.bf16 %v312_v13, %v311_v12  ;;  %v313_v18 = vld [vmem:[%s1213_s6 + $0x30] sm:$0xff]  ;;  %v314_v19 = vld [vmem:[%s1213_s6 + $0x38] sm:$0xff]  ;;  %s1305_s8 = scalar_lea.vmem %s1437_s2, %s726_s23  ;;  %s1379_s26 = scalar_lea.vmem %s1438_s3, %s727_s11 }
  0x52   : > { %767 = vmatpush3.bf16.msra.mxu0 %v1227_v7  ;;  %787 = vmatpush3.bf16.msra.mxu1 %v1222_v3  ;;  %v1251_v17 = vpack.c.bf16 %v288_v15, %v287_v14  ;;  %v289_v20 = vld [vmem:[%s1207_s20 + $0x30] sm:$0xff]  ;;  %v290_v21 = vld [vmem:[%s1207_s20 + $0x38] sm:$0xff]  ;;  %v1262_v22 = vpack.c.bf16 %v314_v19, %v313_v18  ;;  %v315_v24 = vld [vmem:[%s1213_s6 + $0x40] sm:$0xff]  ;;  %275 = vst.msk [vmem:[%s1305_s8 + $0x10] sm:$0xff] %vm272_vm0, %v1031_v40 }
  0x53   : > { %768 = vmatprep.subr.bf16.mxu0 %v1236_v11  ;;  %788 = vmatprep.subr.bf16.mxu1 %v1232_v10  ;;  %v1265_v23 = vpack.c.bf16 %v290_v21, %v289_v20  ;;  %v316_v25 = vld [vmem:[%s1213_s6 + $0x48] sm:$0xff]  ;;  %v291_v26 = vld [vmem:[%s1207_s20 + $0x40] sm:$0xff]  ;;  %v317_v30 = vld [vmem:[%s1213_s6 + $0x50] sm:$0xff]  ;;  %273 = vst.msk [vmem:[%s1305_s8] sm:$0xff] %vm272_vm0, %v1031_v40 }
  0x54   : > { %414 = vxpose.xlu1.c.b16.cont [2/8] (narrow) %v1232_v10, 32  ;;  %v292_v27 = vld [vmem:[%s1207_s20 + $0x48] sm:$0xff]  ;;  %v1276_v28 = vpack.c.bf16 %v316_v25, %v315_v24  ;;  %v318_v31 = vld [vmem:[%s1213_s6 + $0x58] sm:$0xff]  ;;  %v293_v32 = vld [vmem:[%s1207_s20 + $0x50] sm:$0xff]  ;;  %274 = vst.msk [vmem:[%s1305_s8 + $0x8] sm:$0xff] %vm272_vm0, %v1031_v40 }
  0x55   : > { %336 = vxpose.xlu0.c.b16.cont [2/8] (narrow) %v1236_v11, 32  ;;  %v1280_v29 = vpack.c.bf16 %v292_v27, %v291_v26  ;;  %v294_v33 = vld [vmem:[%s1207_s20 + $0x58] sm:$0xff]  ;;  %v1294_v34 = vpack.c.bf16 %v318_v31, %v317_v30  ;;  %v319_v36 = vld [vmem:[%s1213_s6 + $0x60] sm:$0xff]  ;;  %v320_v37 = vld [vmem:[%s1213_s6 + $0x68] sm:$0xff]  ;;  %276 = vst.msk [vmem:[%s1305_s8 + $0x18] sm:$0xff] %vm272_vm0, %v1031_v40 }
  0x56   : > { %769 = vmatpush3.bf16.msra.mxu0 %v1236_v11  ;;  %789 = vmatpush3.bf16.msra.mxu1 %v1232_v10  ;;  %v1298_v35 = vpack.c.bf16 %v294_v33, %v293_v32  ;;  %v295_v38 = vld [vmem:[%s1207_s20 + $0x60] sm:$0xff]  ;;  %v296_v39 = vld [vmem:[%s1207_s20 + $0x68] sm:$0xff]  ;;  %277 = vst.msk [vmem:[%s1305_s8 + $0x20] sm:$0xff] %vm272_vm0, %v1031_v40  ;;  %278 = vst.msk [vmem:[%s1305_s8 + $0x28] sm:$0xff] %vm272_vm0, %v1031_v40  ;;  %v329_v41 = vpack.c.bf16 %v320_v37, %v319_v36 }
  0x57   : > { %770 = vmatprep.subr.bf16.mxu0 %v1251_v17  ;;  %790 = vmatprep.subr.bf16.mxu1 %v1248_v16  ;;  %279 = vst.msk [vmem:[%s1305_s8 + $0x30] sm:$0xff] %vm272_vm0, %v1031_v40  ;;  %280 = vst.msk [vmem:[%s1305_s8 + $0x38] sm:$0xff] %vm272_vm0, %v1031_v40  ;;  %v305_v42 = vpack.c.bf16 %v296_v39, %v295_v38  ;;  %v321_v43 = vld [vmem:[%s1213_s6 + $0x70] sm:$0xff]  ;;  %v322_v44 = vld [vmem:[%s1213_s6 + $0x78] sm:$0xff] }
  0x58   : > { %415 = vxpose.xlu1.c.b16.cont [3/8] (narrow) %v1248_v16, 32  ;;  %v297_v45 = vld [vmem:[%s1207_s20 + $0x70] sm:$0xff]  ;;  %v298_v46 = vld [vmem:[%s1207_s20 + $0x78] sm:$0xff]  ;;  %v330_v47 = vpack.c.bf16 %v322_v44, %v321_v43  ;;  %281 = vst.msk [vmem:[%s1379_s26] sm:$0xff] %vm272_vm0, %v1031_v40  ;;  %282 = vst.msk [vmem:[%s1379_s26 + $0x8] sm:$0xff] %vm272_vm0, %v1031_v40 }
  0x59   : > { %337 = vxpose.xlu0.c.b16.cont [3/8] (narrow) %v1251_v17, 32  ;;  %v306_v48 = vpack.c.bf16 %v298_v46, %v297_v45  ;;  %v333_v55 = vld [vmem:[%s1305_s8 + $0x10] sm:$0xff] }
  0x5a   : > { %771 = vmatpush3.bf16.msra.mxu0 %v1251_v17  ;;  %791 = vmatpush3.bf16.msra.mxu1 %v1248_v16  ;;  %v331_v58 = vld [vmem:[%s1305_s8] sm:$0xff] }
  0x5b   : > { %772 = vmatprep.subr.bf16.mxu0 %v1265_v23  ;;  %792 = vmatprep.subr.bf16.mxu1 %v1262_v22  ;;  %v332_v5 = vld [vmem:[%s1305_s8 + $0x8] sm:$0xff] }
  0x5c   : > { %416 = vxpose.xlu1.c.b16.cont [4/8] (narrow) %v1262_v22, 32  ;;  %v334_v63 = vld [vmem:[%s1305_s8 + $0x18] sm:$0xff] }
  0x5d   : > { %338 = vxpose.xlu0.c.b16.cont [4/8] (narrow) %v1265_v23, 32  ;;  %v409_v56 = vld [vmem:[%s1305_s8 + $0x20] sm:$0xff]  ;;  %v410_v0 = vld [vmem:[%s1305_s8 + $0x28] sm:$0xff] }
  0x5e   : > { %773 = vmatpush3.bf16.msra.mxu0 %v1265_v23  ;;  %793 = vmatpush3.bf16.msra.mxu1 %v1262_v22  ;;  %v411_v54 = vld [vmem:[%s1305_s8 + $0x30] sm:$0xff]  ;;  %v412_v59 = vld [vmem:[%s1305_s8 + $0x38] sm:$0xff] }
  0x5f   : > { %774 = vmatprep.subr.bf16.mxu0 %v1280_v29  ;;  %794 = vmatprep.subr.bf16.mxu1 %v1276_v28  ;;  %v529_v14 = vld [vmem:[%s1379_s26 + $0x8] sm:$0xff]  ;;  %v486_v15 = vld [vmem:[%s1379_s26] sm:$0xff] }
  0x60   : > { %417 = vxpose.xlu1.c.b16.cont [5/8] (narrow) %v1276_v28, 32 }
  0x61   : > { %339 = vxpose.xlu0.c.b16.cont [5/8] (narrow) %v1280_v29, 32 }
  0x62   : > { %775 = vmatpush3.bf16.msra.mxu0 %v1280_v29  ;;  %795 = vmatpush3.bf16.msra.mxu1 %v1276_v28 }
  0x63   : > { %776 = vmatprep.subr.bf16.mxu0 %v1298_v35  ;;  %796 = vmatprep.subr.bf16.mxu1 %v1294_v34 }
  0x64   : > { %418 = vxpose.xlu1.c.b16.cont [6/8] (narrow) %v1294_v34, 32 }
  0x65   : > { %340 = vxpose.xlu0.c.b16.cont [6/8] (narrow) %v1298_v35, 32 }
  0x66   : > { %777 = vmatpush3.bf16.msra.mxu0 %v1298_v35  ;;  %797 = vmatpush3.bf16.msra.mxu1 %v1294_v34 }
  0x67   : > { %778 = vmatprep.subr.bf16.mxu0 %v305_v42  ;;  %798 = vmatprep.subr.bf16.mxu1 %v329_v41 }
  0x68   : > { %419 = vxpose.xlu1.c.b16.cont [7/8] (narrow) %v329_v41, 32 }
  0x69   : > { %341 = vxpose.xlu0.c.b16.cont [7/8] (narrow) %v305_v42, 32 }
  0x6a   : > { %779 = vmatpush3.bf16.msra.mxu0 %v305_v42  ;;  %799 = vmatpush3.bf16.msra.mxu1 %v329_v41 }
  0x6b   : > { %800 = vmatprep.subr.bf16.mxu1 %v330_v47  ;;  %780 = vmatprep.subr.bf16.mxu0 %v306_v48 }
  0x6c   : > { %420 = vxpose.xlu1.c.b16.end [8/8] (narrow) %v330_v47, 32 }
  0x6d   : > { %342 = vxpose.xlu0.c.b16.end [8/8] (narrow) %v306_v48, 32 }
  0x6e   : > { %781 = vmatpush3.bf16.msra.mxu0 %v306_v48  ;;  %801 = vmatpush3.bf16.msra.mxu1 %v330_v47 }
  0x6f   : > { %826 = vmatprep.subr.bf16.mxu1 %v1031_v40  ;;  %806 = vmatprep.subr.bf16.mxu0 %v1031_v40 }
  0xb6   : > { %v421_v49 = vpop.trf.xlu1 }
  0xb7   : > { %v343_v50 = vpop.trf.xlu0  ;;  %802 = vmatprep.mubr.bf16.mxu1 %v421_v49 }
  0xb8   : > { %782 = vmatprep.mubr.bf16.mxu0 %v343_v50 }
  0xba   : > { %v422_v51 = vpop.trf.xlu1 }
  0xbb   : > { %v344_v52 = vpop.trf.xlu0  ;;  %803 = vmatmul.mubr.bf16.vlgmr.msra.gmra.mrb[0].mxu1 %v422_v51 }
  0xbc   : > { %783 = vmatmul.mubr.bf16.vlgmr.msra.gmra.mrb[0].mxu0 %v344_v52  ;;  %827 = vmatpush3.bf16.msra.mxu1 %v1222_v3 }
  0xbd   : > { %807 = vmatpush3.bf16.msra.mxu0 %v1227_v7  ;;  %828 = vmatprep.subr.bf16.mxu1 %v1031_v40 }
  0xbe   : > { %808 = vmatprep.subr.bf16.mxu0 %v1031_v40  ;;  %822 = vmatprep.mubr.msk.bf16.mxu0 %vm1032_vm1, %v1031_v40 }
  0xbf   : > { %842 = vmatprep.mubr.msk.bf16.mxu1 %vm1032_vm1, %v1031_v40 }
  0xc0   : > { %829 = vmatpush3.bf16.msra.mxu1 %v1232_v10 }
  0xc1   : > { %809 = vmatpush3.bf16.msra.mxu0 %v1236_v11  ;;  %830 = vmatprep.subr.bf16.mxu1 %v1031_v40 }
  0xc2   : > { %810 = vmatprep.subr.bf16.mxu0 %v1031_v40 }
  0xc4   : > { %831 = vmatpush3.bf16.msra.mxu1 %v1248_v16 }
  0xc5   : > { %811 = vmatpush3.bf16.msra.mxu0 %v1251_v17  ;;  %832 = vmatprep.subr.bf16.mxu1 %v1031_v40 }
  0xc6   : > { %812 = vmatprep.subr.bf16.mxu0 %v1031_v40 }
  0xc8   : > { %833 = vmatpush3.bf16.msra.mxu1 %v1262_v22 }
  0xc9   : > { %813 = vmatpush3.bf16.msra.mxu0 %v1265_v23  ;;  %834 = vmatprep.subr.bf16.mxu1 %v1031_v40 }
  0xca   : > { %814 = vmatprep.subr.bf16.mxu0 %v1031_v40 }
  0xcc   : > { %835 = vmatpush3.bf16.msra.mxu1 %v1276_v28 }
  0xcd   : > { %815 = vmatpush3.bf16.msra.mxu0 %v1280_v29  ;;  %836 = vmatprep.subr.bf16.mxu1 %v1031_v40 }
  0xce   : > { %816 = vmatprep.subr.bf16.mxu0 %v1031_v40 }
  0xd0   : > { %837 = vmatpush3.bf16.msra.mxu1 %v1294_v34 }
  0xd1   : > { %817 = vmatpush3.bf16.msra.mxu0 %v1298_v35  ;;  %838 = vmatprep.subr.bf16.mxu1 %v1031_v40 }
  0xd2   : > { %818 = vmatprep.subr.bf16.mxu0 %v1031_v40 }
  0xd4   : > { %839 = vmatpush3.bf16.msra.mxu1 %v329_v41 }
  0xd5   : > { %819 = vmatpush3.bf16.msra.mxu0 %v305_v42  ;;  %840 = vmatprep.subr.bf16.mxu1 %v1031_v40 }
  0xd6   : > { %820 = vmatprep.subr.bf16.mxu0 %v1031_v40 }
  0xd8   : > { %841 = vmatpush3.bf16.msra.mxu1 %v330_v47 }
  0xd9   : > { %821 = vmatpush3.bf16.msra.mxu0 %v306_v48 }
  0xdb   : > { %843 = vmatmul.mubr.bf16.vlgmr.msra.gmra.mrb[4].mxu1 %v1033_v53 }
  0xdc   : > { %823 = vmatmul.mubr.bf16.vlgmr.msra.gmra.mrb[4].mxu0 %v1033_v53 }
 0x18e   : > { %v804_v57 = vpop.f32.mrb[0].mxu1 }
 0x18f   : > { %v784_v60 = vpop.f32.mrb[0].mxu0  ;;  %v480_v61 = vadd.f32 %v804_v57, %v411_v54  ;;  %v463_v62 = vpop.f32.mrb[1].mxu1 }
 0x190   : > { %v402_v1 = vadd.f32 %v784_v60, %v333_v55  ;;  %v385_v2 = vpop.f32.mrb[1].mxu0  ;;  %v478_v3 = vadd.f32 %v463_v62, %v409_v56  ;;  %v805_v4 = vpop.f32.mrb[2].mxu1 }
 0x191   : > { %484 = vst.msk [vmem:[%s1305_s8 + $0x30] sm:$0xff] %vm272_vm0, %v480_v61  ;;  %v400_v6 = vadd.f32 %v385_v2, %v331_v58  ;;  %v785_v7 = vpop.f32.mrb[2].mxu0  ;;  %v481_v8 = vadd.f32 %v805_v4, %v412_v59  ;;  %v466_v9 = vpop.f32.mrb[3].mxu1 }
 0x192   : > { %407 = vst.msk [vmem:[%s1305_s8 + $0x10] sm:$0xff] %vm272_vm0, %v402_v1  ;;  %482 = vst.msk [vmem:[%s1305_s8 + $0x20] sm:$0xff] %vm272_vm0, %v478_v3  ;;  %v403_v10 = vadd.f32 %v785_v7, %v334_v63  ;;  %v388_v11 = vpop.f32.mrb[3].mxu0  ;;  %v479_v12 = vadd.f32 %v466_v9, %v410_v0 }
 0x193   : > { %405 = vst.msk [vmem:[%s1305_s8] sm:$0xff] %vm272_vm0, %v400_v6  ;;  %485 = vst.msk [vmem:[%s1305_s8 + $0x38] sm:$0xff] %vm272_vm0, %v481_v8  ;;  %v401_v13 = vadd.f32 %v388_v11, %v332_v5 }
 0x194   : > { %408 = vst.msk [vmem:[%s1305_s8 + $0x18] sm:$0xff] %vm272_vm0, %v403_v10  ;;  %483 = vst.msk [vmem:[%s1305_s8 + $0x28] sm:$0xff] %vm272_vm0, %v479_v12 }
 0x195   : > { %406 = vst.msk [vmem:[%s1305_s8 + $0x8] sm:$0xff] %vm272_vm0, %v401_v13 }
 0x1ae   : > { %v564_v16 = vpop.f32.mrb[4].mxu1 }
 0x1af   : > { %v521_v17 = vpop.f32.mrb[4].mxu0  ;;  %v570_v18 = vadd.f32 %v564_v16, %v529_v14  ;;  %v844_v19 = vpop.f32.mrb[5].mxu1 }
 0x1b0   : > { %v527_v20 = vadd.f32 %v521_v17, %v486_v15  ;;  %v824_v21 = vpop.f32.mrb[5].mxu0  ;;  %v567_v22 = vpop.f32.mrb[6].mxu1 }
 0x1b1   : > { %571 = vst.msk [vmem:[%s1379_s26 + $0x8] sm:$0xff] %vm272_vm0, %v570_v18  ;;  %v524_v23 = vpop.f32.mrb[6].mxu0  ;;  %v845_v24 = vpop.f32.mrb[7].mxu1 }
 0x1b2   : > { %528 = vst.msk [vmem:[%s1379_s26] sm:$0xff] %vm272_vm0, %v527_v20  ;;  %v825_v25 = vpop.f32.mrb[7].mxu0 }
 0x1b3 PF: > { %s20_s17 = sadd.s32 1, %s1025_s17   ;;  %s1445_s12 = smov %s1009_s13 }
 0x1b4   : > { %p17_p11 = scmp.ge.s32.totalorder %s20_s17, 4   ;;  %s1446_s13 = smov %s1013_s14 }
 0x1b5   : > { %s1447_s14 = smov %s1103_s24  ;;  %s1448_s15 = smov %s1021_s16 }
 0x1b6   : > { %s1449_s16 = smov %s1451_s19  ;;  %19 = sbr.rel (!%p17_p11) target bundleno = 6 (0x6), region = 97 }
 0x1bd   :  { %609 = vsyncpa [#allocation3], 1 }
 0x1be   :  { %611 = vsyncpa [#allocation3 + $0x1], 1 }
 0x1bf   :  { %612 = vsyncpa [#allocation5], 1 }
 0x1c0   :  { %614 = vsyncpa [#allocation5 + $0x1], 1 }

// kernel: multi_head_guidance_qk.3
= control target key start
LH: loop header
LB: loop body
LE: loop exit
PB: predicated region body
PF: predicated region fallthrough
CT: control target
= control target key end

     0   :  { %s1236_s30 = smov 0   ;;  %s1438_s0 = inlined_call_operand.vmem [shape: f32[32,256], index: 0, kind: input, shape index: {}]   ;;  %s1439_s1 = inlined_call_operand.vmem [shape: f32[32,32], index: 1, kind: input, shape index: {}]   ;;  %s1440_s2 = inlined_call_operand.vmem [shape: bf16[256,256], index: 2, kind: input, shape index: {}]   ;;  %s1441_s3 = inlined_call_operand.vmem [shape: bf16[32,256], index: 3, kind: input, shape index: {}]   ;;  %s1442_s4 = inlined_call_operand.vmem [shape: bf16[256,128], index: 4, kind: input, shape index: {}]   ;;  %s1443_s5 = inlined_call_operand.vmem [shape: f32[1,256], index: 5, kind: input, shape index: {}]   ;;  %s1444_s6 = inlined_call_operand.vmem [shape: f32[1,256], index: 6, kind: input, shape index: {}]   ;;  %s1445_s7 = inlined_call_operand.vmem [shape: f32[1,256], index: 7, kind: input, shape index: {}]   ;;  %s1446_s8 = inlined_call_operand.vmem [shape: f32[1,256], index: 8, kind: input, shape index: {}]   ;;  %s1447_s9 = inlined_call_operand.vmem [shape: f32[32,128], index: 9, kind: output, shape index: {}]  }
   0x1 LB: > { %s998_s10 = sadd.s32 4294967295, %s1183_s30   ;;  %p1002_p0 = scmp.ge.s32.totalorder %s1183_s30, 1  ;;  %s1183_s30 = sphi %s1236_s30, %s19_s30  }
   0x2   : > { %p300_p1 = scmp.lt.s32.totalorder %s1183_s30, 3 }
   0x4   : > { %p301_p2 = pnand %p1002_p0, %p300_p1 }
   0x5   : > { %v1099_v0 = vld [vmem:[%s1440_s2 + $0x4] ss:$8 sps:$4 sm:$0xff] (!%p301_p2)   ;;  %v1101_v1 = vld [vmem:[%s1440_s2] ss:$8 sps:$4 sm:$0xff] (!%p301_p2)   ;;  %v1185_v2 = vmov (!%p301_p2), 0   ;;  %s1003_s23 = sshll.u32 (!%p301_p2), %s998_s10, 1 }
   0x6   : > { %304 = sbr.rel (%p301_p2) target bundleno = 538 (0x21a), region = 56  ;;  %698 = vmatprep.mubr.bf16.mxu1 (!%p301_p2), %v1185_v2  ;;  %563 = vmatprep.subr.bf16.mxu0 (!%p301_p2), %v1099_v0  ;;  %v1102_v3 = vld [vmem:[%s1440_s2 + $0x14] ss:$8 sps:$4 sm:$0xff] (!%p301_p2)   ;;  %v1104_v4 = vld [vmem:[%s1440_s2 + $0x10] ss:$8 sps:$4 sm:$0xff] (!%p301_p2)   ;;  %p343_p3 = scmp.lt.s32.totalorder (!%p301_p2), %s1003_s23, 3  ;;  %v608_v2 = vlaneseq (!%p301_p2) }
   0x7   : > { %564 = vmatpush1.bf16.msra.mxu0 (!%p301_p2), %v1101_v1  ;;  %v1105_v5 = vld [vmem:[%s1440_s2 + $0x24] ss:$8 sps:$4 sm:$0xff] (!%p301_p2)   ;;  %v1107_v6 = vld [vmem:[%s1440_s2 + $0x20] ss:$8 sps:$4 sm:$0xff] (!%p301_p2)   ;;  %v1108_v7 = vld [vmem:[%s1440_s2 + $0x34] ss:$8 sps:$4 sm:$0xff] (!%p301_p2)  }
   0x8   : > { %565 = vmatprep.subr.bf16.mxu0 (!%p301_p2), %v1102_v3  ;;  %v1110_v8 = vld [vmem:[%s1440_s2 + $0x30] ss:$8 sps:$4 sm:$0xff] (!%p301_p2)   ;;  %v1111_v9 = vld [vmem:[%s1440_s2 + $0x44] ss:$8 sps:$4 sm:$0xff] (!%p301_p2)   ;;  %v1113_v10 = vld [vmem:[%s1440_s2 + $0x40] ss:$8 sps:$4 sm:$0xff] (!%p301_p2)  }
   0x9   : > { %v1114_v11 = vld [vmem:[%s1440_s2 + $0x54] ss:$8 sps:$4 sm:$0xff] (!%p301_p2)   ;;  %v1116_v12 = vld [vmem:[%s1440_s2 + $0x50] ss:$8 sps:$4 sm:$0xff] (!%p301_p2)   ;;  %v1141_v13 = vld [vmem:[%s1441_s3 + $0x4] ss:$8 sps:$4 sm:$0xff] (!%p301_p2)  }
   0xa   : > { %v1143_v14 = vld [vmem:[%s1441_s3] ss:$8 sps:$4 sm:$0xff] (!%p301_p2)   ;;  %v1117_v15 = vld [vmem:[%s1440_s2 + $0x64] ss:$8 sps:$4 sm:$0xff] (!%p301_p2)   ;;  %666 = vmatprep.subr.bf16.mxu1 (!%p301_p2), %v1141_v13  ;;  %v1147_v16 = vld [vmem:[%s1441_s3 + $0x14] ss:$8 sps:$4 sm:$0xff] (!%p301_p2)  }
   0xb   : > { %566 = vmatpush1.bf16.msra.mxu0 (!%p301_p2), %v1104_v4  ;;  %667 = vmatpush1.bf16.msra.mxu1 (!%p301_p2), %v1143_v14  ;;  %v1149_v17 = vld [vmem:[%s1441_s3 + $0x10] ss:$8 sps:$4 sm:$0xff] (!%p301_p2)   ;;  %v1119_v18 = vld [vmem:[%s1440_s2 + $0x60] ss:$8 sps:$4 sm:$0xff] (!%p301_p2)   ;;  %v1120_v19 = vld [vmem:[%s1440_s2 + $0x74] ss:$8 sps:$4 sm:$0xff] (!%p301_p2)  }
   0xc   : > { %567 = vmatprep.subr.bf16.mxu0 (!%p301_p2), %v1105_v5  ;;  %668 = vmatprep.subr.bf16.mxu1 (!%p301_p2), %v1147_v16  ;;  %v1122_v23 = vld [vmem:[%s1440_s2 + $0x70] ss:$8 sps:$4 sm:$0xff] (!%p301_p2)   ;;  %v1123_v26 = vld [vmem:[%s1440_s2 + $0x84] ss:$8 sps:$4 sm:$0xff] (!%p301_p2)   ;;  %vm662_vm0 = vcmask (!%p301_p2), 261120   ;;  %v609_v3 = vshrl.u32 (!%p301_p2), %v608_v2, 7 }
   0xd   : > { %s1449_s23 = smov (!%p343_p3, %s1003_s23), 3  ;;  %v1153_v28 = vld [vmem:[%s1442_s4 + $0x40] sm:$0xff]   ;;  %v1155_v30 = vld [vmem:[%s1442_s4 + $0x48] sm:$0xff]   ;;  %v1126_v32 = vld [vmem:[%s1440_s2 + $0x94] ss:$8 sps:$4 sm:$0xff]  }
   0xe   : > { %s1007_s16 = sshll.u32 %s1449_s23, 3  ;;  %s1067_s17 = sshll.u32 %s1449_s23, 4  ;;  %v1154_v29 = vld [vmem:[%s1442_s4] sm:$0xff]   ;;  %v1156_v33 = vld [vmem:[%s1442_s4 + $0x8] sm:$0xff]   ;;  %v1157_v34 = vld [vmem:[%s1442_s4 + $0x50] sm:$0xff]   ;;  %v610_v4 = vsub.s32 0, %v609_v3 }
   0xf   : > { %568 = vmatpush1.bf16.msra.mxu0 %v1107_v6  ;;  %s353_s27 = scalar_lea.vmem %s1439_s1, %s1007_s16  ;;  %s1301_s10 = scalar_lea.vmem %s1438_s0, %s1067_s17  ;;  %669 = vmatpush1.bf16.msra.mxu1 %v1149_v17  ;;  %v1125_v31 = vld [vmem:[%s1440_s2 + $0x80] ss:$8 sps:$4 sm:$0xff]   ;;  %v1158_v35 = vld [vmem:[%s1442_s4 + $0x10] sm:$0xff]   ;;  %v1159_v37 = vld [vmem:[%s1442_s4 + $0x58] sm:$0xff]   ;;  %v614_v6 = vsub.s32 1, %v609_v3 }
  0x10   : > { %569 = vmatprep.subr.bf16.mxu0 %v1108_v7  ;;  %v368_v20 = vld [vmem:[%s353_s27] sm:$0xff]  ;;  %v369_v21 = vld [vmem:[%s353_s27 + $0x8] sm:$0xff]  ;;  %v365_v25 = vld [vmem:[%s1301_s10 + $0x18] sm:$0xff]  ;;  %1068 = vmatprep.subr.bf16.mxu1 %v1153_v28  ;;  %s359_s27 = scalar_lea.vmem %s1447_s9, %s1007_s16 }
  0x11   : > { %v363_v22 = vld [vmem:[%s1301_s10 + $0x8] sm:$0xff]  ;;  %v370_v24 = vpack.c.bf16 %v369_v21, %v368_v20  ;;  %v1128_v36 = vld [vmem:[%s1440_s2 + $0x90] ss:$8 sps:$4 sm:$0xff]   ;;  %v1132_v41 = vld [vmem:[%s1440_s2 + $0xb4] ss:$8 sps:$4 sm:$0xff]  }
  0x12   : > { %v367_v27 = vpack.c.bf16 %v365_v25, %v363_v22  ;;  %v1129_v38 = vld [vmem:[%s1440_s2 + $0xa4] ss:$8 sps:$4 sm:$0xff]   ;;  %v1160_v39 = vld [vmem:[%s1442_s4 + $0x18] sm:$0xff]   ;;  %v1131_v40 = vld [vmem:[%s1440_s2 + $0xa0] ss:$8 sps:$4 sm:$0xff]  }
  0x13   : > { %570 = vmatpush1.bf16.msra.mxu0 %v1110_v8  ;;  %1046 = vmatmul.mubr.msk.bf16.vlgmr.msra.gmra.mrb[0].mxu1 %vm662_vm0, %v370_v24  ;;  %v1134_v42 = vld [vmem:[%s1440_s2 + $0xb0] ss:$8 sps:$4 sm:$0xff]   ;;  %v1135_v43 = vld [vmem:[%s1440_s2 + $0xc4] ss:$8 sps:$4 sm:$0xff]   ;;  %v1137_v44 = vld [vmem:[%s1440_s2 + $0xc0] ss:$8 sps:$4 sm:$0xff]  }
  0x14   : > { %571 = vmatprep.subr.bf16.mxu0 %v1111_v9  ;;  %595 = vmatprep.mubr.bf16.mxu0 %v367_v27  ;;  %v1138_v45 = vld [vmem:[%s1440_s2 + $0xd4] ss:$8 sps:$4 sm:$0xff]   ;;  %v1140_v46 = vld [vmem:[%s1440_s2 + $0xd0] ss:$8 sps:$4 sm:$0xff]   ;;  %v1144_v47 = vld [vmem:[%s1440_s2 + $0xe4] ss:$8 sps:$4 sm:$0xff]  }
  0x15   : > { %1069 = vmatpush3.bf16.msra.mxu1 %v1154_v29  ;;  %v1146_v48 = vld [vmem:[%s1440_s2 + $0xe0] ss:$8 sps:$4 sm:$0xff]   ;;  %v1150_v49 = vld [vmem:[%s1440_s2 + $0xf4] ss:$8 sps:$4 sm:$0xff]   ;;  %v1152_v50 = vld [vmem:[%s1440_s2 + $0xf0] ss:$8 sps:$4 sm:$0xff]  }
  0x16   : > { %1070 = vmatprep.subr.bf16.mxu1 %v1155_v30  ;;  %v362_v51 = vld [vmem:[%s1301_s10] sm:$0xff]  ;;  %v364_v52 = vld [vmem:[%s1301_s10 + $0x10] sm:$0xff]  ;;  %v1163_v56 = vld [vmem:[%s1442_s4 + $0x68] sm:$0xff]  }
  0x17   : > { %572 = vmatpush1.bf16.msra.mxu0 %v1113_v10  ;;  %v366_v53 = vpack.c.bf16 %v364_v52, %v362_v51  ;;  %v1161_v54 = vld [vmem:[%s1442_s4 + $0x60] sm:$0xff]   ;;  %v1164_v57 = vld [vmem:[%s1442_s4 + $0x28] sm:$0xff]   ;;  %v1165_v58 = vld [vmem:[%s1442_s4 + $0x70] sm:$0xff]  }
  0x18   : > { %573 = vmatprep.subr.bf16.mxu0 %v1114_v11  ;;  %v1162_v55 = vld [vmem:[%s1442_s4 + $0x20] sm:$0xff]   ;;  %v1166_v59 = vld [vmem:[%s1442_s4 + $0x30] sm:$0xff]   ;;  %v1167_v60 = vld [vmem:[%s1442_s4 + $0x78] sm:$0xff]  }
  0x19   : > { %1071 = vmatpush3.bf16.msra.mxu1 %v1156_v33  ;;  %v1168_v61 = vld [vmem:[%s1442_s4 + $0x38] sm:$0xff]   ;;  %v709_v5 = vld [vmem:[%s1445_s7] sm:$0x3] }
  0x1a   : > { %1072 = vmatprep.subr.bf16.mxu1 %v1157_v34  ;;  %v714_v7 = vrot.slane %v709_v5, %v610_v4  ;;  %v725_v8 = vld [vmem:[%s1446_s8] sm:$0x3]  ;;  %v718_v9 = vrot.slane %v709_v5, %v614_v6 }
  0x1b   : > { %574 = vmatpush1.bf16.msra.mxu0 %v1116_v12  ;;  %v606_v10 = vld [vmem:[%s1443_s5] sm:$0x3]  ;;  %v730_v13 = vrot.slane %v725_v8, %v610_v4  ;;  %v734_v16 = vrot.slane %v725_v8, %v614_v6 }
  0x1c   : > { %575 = vmatprep.subr.bf16.mxu0 %v1117_v15  ;;  %v622_v11 = vld [vmem:[%s1444_s6] sm:$0x3]  ;;  %v611_v14 = vrot.slane %v606_v10, %v610_v4  ;;  %v615_v17 = vrot.slane %v606_v10, %v614_v6 }
  0x1d   : > { %1073 = vmatpush3.bf16.msra.mxu1 %v1158_v35  ;;  %v631_v20 = vrot.slane %v622_v11, %v614_v6 }
  0x1e   : > { %1074 = vmatprep.subr.bf16.mxu1 %v1159_v37 }
  0x1f   : > { %576 = vmatpush1.bf16.msra.mxu0 %v1119_v18  ;;  %v627_v18 = vrot.slane %v622_v11, %v610_v4 }
  0x20   : > { %577 = vmatprep.subr.bf16.mxu0 %v1120_v19 }
  0x21   : > { %1075 = vmatpush3.bf16.msra.mxu1 %v1160_v39 }
  0x22   : > { %1076 = vmatprep.subr.bf16.mxu1 %v1161_v54 }
  0x23   : > { %578 = vmatpush1.bf16.msra.mxu0 %v1122_v23 }
  0x24   : > { %579 = vmatprep.subr.bf16.mxu0 %v1123_v26 }
  0x25   : > { %1077 = vmatpush3.bf16.msra.mxu1 %v1162_v55 }
  0x26   : > { %1078 = vmatprep.subr.bf16.mxu1 %v1163_v56 }
  0x27   : > { %580 = vmatpush1.bf16.msra.mxu0 %v1125_v31 }
  0x28   : > { %581 = vmatprep.subr.bf16.mxu0 %v1126_v32 }
  0x29   : > { %1079 = vmatpush3.bf16.msra.mxu1 %v1164_v57 }
  0x2a   : > { %1080 = vmatprep.subr.bf16.mxu1 %v1165_v58 }
  0x2b   : > { %582 = vmatpush1.bf16.msra.mxu0 %v1128_v36 }
  0x2c   : > { %583 = vmatprep.subr.bf16.mxu0 %v1129_v38 }
  0x2d   : > { %1081 = vmatpush3.bf16.msra.mxu1 %v1166_v59 }
  0x2e   : > { %1082 = vmatprep.subr.bf16.mxu1 %v1167_v60 }
  0x2f   : > { %584 = vmatpush1.bf16.msra.mxu0 %v1131_v40 }
  0x30   : > { %585 = vmatprep.subr.bf16.mxu0 %v1132_v41 }
  0x31   : > { %1083 = vmatpush3.bf16.msra.mxu1 %v1168_v61 }
  0x33   : > { %586 = vmatpush1.bf16.msra.mxu0 %v1134_v42 }
  0x34   : > { %587 = vmatprep.subr.bf16.mxu0 %v1135_v43 }
  0x37   : > { %588 = vmatpush1.bf16.msra.mxu0 %v1137_v44 }
  0x38   : > { %589 = vmatprep.subr.bf16.mxu0 %v1138_v45 }
  0x3b   : > { %590 = vmatpush1.bf16.msra.mxu0 %v1140_v46 }
  0x3c   : > { %591 = vmatprep.subr.bf16.mxu0 %v1144_v47 }
  0x3f   : > { %592 = vmatpush1.bf16.msra.mxu0 %v1146_v48 }
  0x40   : > { %593 = vmatprep.subr.bf16.mxu0 %v1150_v49 }
  0x43   : > { %594 = vmatpush1.bf16.msra.mxu0 %v1152_v50 }
  0x46   : > { %596 = vmatmul.mubr.bf16.vlgmr.msra.gmra.mrb[0].mxu0 %v366_v53 }
  0xe6   : > { %v700_v62 = vpop.f32.mrb[0].mxu1 }
  0xe7   : > { %v702_v63 = vpop.f32.mrb[1].mxu1  ;;  %v721_v12 = vmul.f32 %v714_v7, %v700_v62 }
  0xe8   : > { %v704_v0 = vpop.f32.mrb[2].mxu1  ;;  %v722_v15 = vmul.f32 %v718_v9, %v702_v63 }
  0xe9   : > { %v706_v1 = vpop.f32.mrb[3].mxu1  ;;  %v737_v21 = vadd.f32 %v730_v13, %v721_v12  ;;  %v723_v22 = vmul.f32 %v714_v7, %v704_v0 }
  0xea   : > { %v738_v25 = vadd.f32 %v734_v16, %v722_v15  ;;  %v724_v26 = vmul.f32 %v718_v9, %v706_v1 }
  0xeb   : > { %v739_v34 = vadd.f32 %v730_v13, %v723_v22 }
  0xec   : > { %v740_v37 = vadd.f32 %v734_v16, %v724_v26 }
 0x119   : > { %v597_v19 = vpop.f32.mrb[0].mxu0 }
 0x11a   : > { %v618_v23 = vmul.f32 %v611_v14, %v597_v19  ;;  %v599_v24 = vpop.f32.mrb[1].mxu0 }
 0x11b   : > { %v619_v27 = vmul.f32 %v615_v17, %v599_v24  ;;  %v601_v28 = vpop.f32.mrb[2].mxu0 }
 0x11c   : > { %v634_v29 = vadd.f32 %v627_v18, %v618_v23  ;;  %v620_v30 = vmul.f32 %v611_v14, %v601_v28  ;;  %v603_v31 = vpop.f32.mrb[3].mxu0 }
 0x11d   : > { %v635_v32 = vadd.f32 %v631_v20, %v619_v27  ;;  %v621_v33 = vmul.f32 %v615_v17, %v603_v31 }
 0x11e   : > { %v741_v35 = vmul.f32 %v737_v21, %v634_v29  ;;  %v636_v36 = vadd.f32 %v627_v18, %v620_v30 }
 0x11f   : > { %v742_v38 = vmul.f32 %v738_v25, %v635_v32  ;;  %v637_v39 = vadd.f32 %v631_v20, %v621_v33 }
 0x120   : > { %v743_v40 = vmul.f32 %v739_v34, %v636_v36 }
 0x121   : > { %v744_v41 = vmul.f32 %v740_v37, %v637_v39 }
 0x122   : > { %v745_v42 = vpack.c.bf16 %v743_v40, %v741_v35 }
 0x123   : > { %v746_v43 = vpack.c.bf16 %v744_v41, %v742_v38 }
 0x125   : > { %907 = vmatprep.mubr.bf16.mxu1 %v746_v43 }
 0x126   : > { %908 = vmatmul.mubr.bf16.vlgmr.msra.gmra.mrb[4].mxu1 %v745_v42 }
 0x1f9   : > { %v1084_v44 = vpop.f32.mrb[4].mxu1 }
 0x1fa   : > { %v1085_v45 = vpop.f32.mrb[5].mxu1 }
 0x1fb   : > { %v1086_v46 = vadd.f32 %v1085_v45, %v1084_v44  ;;  %v1087_v47 = vpop.f32.mrb[6].mxu1 }
 0x1fc   : > { %v1088_v48 = vpop.f32.mrb[7].mxu1 }
 0x1fd   : > { %v1063_v49 = vmul.f32 -1.442695, %v1086_v46  ;;  %v1089_v50 = vadd.f32 %v1088_v48, %v1087_v47 }
 0x1ff   : > { %1169 = vpow2.f32 %v1063_v49  ;;  %v1064_v51 = vmul.f32 -1.442695, %v1089_v50 }
 0x201   : > { %1171 = vpow2.f32 %v1064_v51 }
 0x209   : > { %v1170_v52 = vpop.eup %1169 }
 0x20a   : > { %v922_v53 = vadd.f32 1.0, %v1170_v52 }
 0x20b   : > { %v1172_v54 = vpop.eup %1171 }
 0x20c   : > { %1173 = vrcp.f32 %v922_v53  ;;  %v923_v55 = vadd.f32 1.0, %v1172_v54 }
 0x20e   : > { %1175 = vrcp.f32 %v923_v55 }
 0x216   : > { %v1174_v56 = vpop.eup %1173 }
 0x217   : > { %928 = vst [vmem:[%s359_s27] sm:$0xff] %v1174_v56 }
 0x218   : > { %v1176_v57 = vpop.eup %1175 }
 0x219   : > { %929 = vst [vmem:[%s359_s27 + $0x8] sm:$0xff] %v1176_v57 }
 0x21a PF: > { %s19_s30 = sadd.s32 1, %s1183_s30  }
 0x21b   : > { %p16_p4 = scmp.ge.s32.totalorder %s19_s30, 4  }
 0x21d   :  { %18 = sbr.rel (!%p16_p4) target bundleno = 1 (0x1), region = 89 }

</bundles_post_ra>
